<compile_context>
chip_gen: v7x
topology: tpu7x:2x2x1
jax: 0.10.0
libtpu: 0.0.40
codegen_flags: <defaults>
</compile_context>

<pallas_src>
import math
import functools

import numpy as np
import jax
import jax.numpy as jnp
from jax.experimental import pallas as pl
from jax.experimental.pallas import tpu as pltpu


# ------------------------------ small helpers ------------------------------

def _vmem_limit(est_bytes):
    """Scoped-VMEM limit derived from the block working set (2x headroom, 32 MiB floor)."""
    return int(min(max(32 * 2 ** 20, 2 * int(est_bytes)), 128 * 2 ** 20))


def _default_exp_in_bf16():
    """bf16 EUP exists on v6e/v7x; keep f32 exponentials on v5e/v4 (no bf16 EUP)."""
    try:
        kind = jax.devices()[0].device_kind.lower()
    except Exception:
        return False
    return ("v6" in kind) or ("v7" in kind)


def _layer_norm(v, w):
    """F.layer_norm(v, [D]) * w  (no bias, eps=1e-5), f32."""
    mu = jnp.mean(v, axis=-1, keepdims=True)
    var = jnp.mean(jnp.square(v - mu), axis=-1, keepdims=True)
    return (v - mu) * jax.lax.rsqrt(var + 1e-5) * w


def _split_heads(t, n_heads):
    """(rows, D) -> (H, rows, hd). Lane slices are 128-aligned when hd % 128 == 0 (cheap).
    TODO(synk): for head_dim < 128 use a lane-dense layout / single relayout instead."""
    rows, d = t.shape
    hd = d // n_heads
    return jnp.stack([t[:, h * hd:(h + 1) * hd] for h in range(n_heads)], axis=0)


def _gelu_tanh(v):
    c0 = math.sqrt(2.0 / math.pi)
    return 0.5 * v * (1.0 + jnp.tanh(c0 * (v + 0.044715 * v * v * v)))


# ------------------------------ stage 1: LN1 + modulate + QKV + rotary ------------------------------

def _qkv_rope_kernel(x_ref, cos_ref, sins_ref, mods_ref, ln1_ref, wqkv_ref,
                     q_ref, k_ref, v_ref, *, n_heads):
    D = x_ref.shape[-1]
    hd = D // n_heads
    sm_scale = 1.0 / math.sqrt(hd)

    shift_msa = mods_ref[0:1, :]
    scale_msa = mods_ref[1:2, :]

    x = x_ref[...].astype(jnp.float32)
    h = _layer_norm(x, ln1_ref[...]) * (1.0 + scale_msa) + shift_msa
    qkv = jnp.dot(h.astype(jnp.bfloat16), wqkv_ref[...],
                  preferred_element_type=jnp.float32)                 # (tq, 3D), f32 acc

    cos = cos_ref[...][None, :, :]        # (1, tq, hd)
    sins = sins_ref[...][None, :, :]      # sign-folded sin: roll(t)*sins == rotate_half(t)*sin

    def rope(t3):                          # t3: (H, tq, hd); rotation on the XLU slot
        return t3 * cos + pltpu.roll(t3, shift=hd // 2, axis=2) * sins

    q3 = rope(_split_heads(qkv[:, 0 * D:1 * D], n_heads))
    k3 = rope(_split_heads(qkv[:, 1 * D:2 * D], n_heads))
    v3 = _split_heads(qkv[:, 2 * D:3 * D], n_heads)

    q_ref[...] = (q3 * sm_scale).astype(q_ref.dtype)   # softmax scale folded into q
    k_ref[...] = k3.astype(k_ref.dtype)
    v_ref[...] = v3.astype(v_ref.dtype)


# ------------------------------ stage 2: flash attention + out-proj + gated residual ------------------------------

def _attn_kernel(q_ref, k_ref, v_ref, x_ref, mods_ref, wout_ref, o_ref,
                 m_sc, l_sc, acc_sc, *, n_heads, exp_in_bf16):
    ki = pl.program_id(2)
    nk = pl.num_programs(2)

    @pl.when(ki == 0)
    def _init():
        m_sc[...] = jnp.full_like(m_sc, -jnp.inf)
        l_sc[...] = jnp.zeros_like(l_sc)
        acc_sc[...] = jnp.zeros_like(acc_sc)

    # online-softmax update, heads batched in single einsums (bf16 MXU operands, f32 acc)
    s = jnp.einsum('hqd,hkd->hqk', q_ref[...], k_ref[...],
                   preferred_element_type=jnp.float32)                # (H, tq, tk)
    m_prev = m_sc[...]
    m_new = jnp.maximum(m_prev, jnp.max(s, axis=-1, keepdims=True))
    alpha = jnp.exp(m_prev - m_new)
    if exp_in_bf16:   # bf16 EUP path (v6e/v7x); m/l bookkeeping stays f32
        p = jnp.exp((s - m_new).astype(jnp.bfloat16))
        l_add = jnp.sum(p.astype(jnp.float32), axis=-1, keepdims=True)
        pv = jnp.einsum('hqk,hkd->hqd', p, v_ref[...],
                        preferred_element_type=jnp.float32)
    else:
        p = jnp.exp(s - m_new)
        l_add = jnp.sum(p, axis=-1, keepdims=True)
        pv = jnp.einsum('hqk,hkd->hqd', p.astype(jnp.bfloat16), v_ref[...],
                        preferred_element_type=jnp.float32)
    l_sc[...] = alpha * l_sc[...] + l_add
    acc_sc[...] = alpha * acc_sc[...] + pv
    m_sc[...] = m_new

    # finalize this q tile: normalize, merge heads, out-proj, first gated residual
    @pl.when(ki == nk - 1)
    def _finalize():
        gate_msa = mods_ref[2:3, :]
        attn3 = acc_sc[...] * pl.reciprocal(l_sc[...], approx=True)   # (H, tq, hd)
        attn = jnp.concatenate([attn3[h] for h in range(n_heads)], axis=-1)   # (tq, D)
        attn_o = jnp.dot(attn.astype(jnp.bfloat16), wout_ref[...],
                         preferred_element_type=jnp.float32)
        o_ref[...] = (x_ref[...].astype(jnp.float32) + gate_msa * attn_o).astype(o_ref.dtype)


# ------------------------------ stage 3: LN2 + modulate + MLP (hidden-dim streamed) ------------------------------

def _mlp_kernel(x1_ref, mods_ref, ln2_ref, w1_ref, b1_ref, w2_ref, b2_ref, o_ref,
                h2_sc, acc_sc):
    hi = pl.program_id(2)
    nh = pl.num_programs(2)

    @pl.when(hi == 0)
    def _init():
        shift_mlp = mods_ref[3:4, :]
        scale_mlp = mods_ref[4:5, :]
        x1 = x1_ref[...].astype(jnp.float32)
        h2 = _layer_norm(x1, ln2_ref[...]) * (1.0 + scale_mlp) + shift_mlp
        h2_sc[...] = h2.astype(jnp.bfloat16)          # reused for every hidden block
        acc_sc[...] = jnp.zeros_like(acc_sc)

    # stream one (D, th) column block of W1 and one (th, D) row block of W2 per step
    m1 = jnp.dot(h2_sc[...], w1_ref[...], preferred_element_type=jnp.float32) + b1_ref[...]
    acc_sc[...] += jnp.dot(_gelu_tanh(m1).astype(jnp.bfloat16), w2_ref[...],
                           preferred_element_type=jnp.float32)

    @pl.when(hi == nh - 1)
    def _finalize():
        gate_mlp = mods_ref[5:6, :]
        x1 = x1_ref[...].astype(jnp.float32)
        o_ref[...] = (x1 + gate_mlp * (acc_sc[...] + b2_ref[...])).astype(o_ref.dtype)


# ------------------------------ parameter preparation (hoisted casts) ------------------------------

def prepare_params(params):
    """Pre-cast weights once (bf16 MXU operands, f32 norms/biases) so no per-call HBM casts."""
    f32, bf16 = jnp.float32, jnp.bfloat16
    return {
        "w_ada_t": params["w_ada_t"].astype(f32),
        "b_ada":   params["b_ada"].astype(f32),
        "ln1_w":   params["ln1_w"].astype(f32),
        "ln2_w":   params["ln2_w"].astype(f32),
        "wqkv_t":  params["wqkv_t"].astype(bf16),
        "wout_t":  params["wout_t"].astype(bf16),
        "w1_t":    params["w1_t"].astype(bf16),
        "b1":      params["b1"].astype(f32),
        "w2_t":    params["w2_t"].astype(bf16),
        "b2":      params["b2"].astype(f32),
    }


# ------------------------------ wrapper ------------------------------

def ada_transformer_block(x, c, cos_hd, sin_hd, params, n_heads, *,
                          block_q=256, block_kv=256, block_h=512, exp_in_bf16=None):
    """AdaTransformerBlock._modulated_forward (inference path).

    x: (B,S,D), c: (B,1,C), cos_hd/sin_hd: (S, head_dim).  `params` should come from
    prepare_params().  Defaults block_q/block_kv=256 target the 256-wide MXU on v6e/v7x;
    use 128 on v5e.  Passing x as bf16 halves the residual-stream DMA if precision allows.
    """
    B, S, D = x.shape
    hd = D // n_heads
    H4 = params["w1_t"].shape[1]
    tq = min(block_q, S)
    tk = min(block_kv, S)
    th = min(block_h, H4)
    assert D % n_heads == 0 and S % tq == 0 and S % tk == 0 and H4 % th == 0
    if exp_in_bf16 is None:
        exp_in_bf16 = _default_exp_in_bf16()

    f32, bf16 = jnp.float32, jnp.bfloat16
    wqkv, wout = params["wqkv_t"], params["wout_t"]
    w1, w2, b1, b2 = params["w1_t"], params["w2_t"], params["b1"], params["b2"]
    ln1, ln2 = params["ln1_w"], params["ln2_w"]

    # adaLN modulation: tiny (B,C)@(C,6D) GEMM once per call, presented as (B,6,D) sublane
    # rows [shift_msa, scale_msa, gate_msa, shift_mlp, scale_mlp, gate_mlp].
    mods = (c[:, 0, :].astype(f32) @ params["w_ada_t"]
            + params["b_ada"][0]).reshape(B, 6, D)

    # rotate_half via pltpu.roll: fold the sign into sin host-side so
    # roll(t, hd//2) * sin_signed == rotate_half(t) * sin.
    half = hd // 2
    cos_hd = cos_hd.astype(f32)
    sin_signed = jnp.concatenate([-sin_hd[:, :half], sin_hd[:, half:]], axis=-1).astype(f32)

    xb = x.dtype.itemsize
    nq, nk, nh = S // tq, S // tk, H4 // th

    # ---- stage 1: LN1 + modulate + QKV projection + rotary -> head-batched bf16 q/k/v ----
    qkv_shape = jax.ShapeDtypeStruct((B, n_heads, S, hd), bf16)
    qkv_idx = lambda b, si: (b, 0, si, 0)
    cost1 = pl.CostEstimate(
        flops=2 * B * S * D * 3 * D + 12 * B * S * D,
        transcendentals=B * S,
        bytes_accessed=B * S * D * xb + D * 3 * D * 2 + 3 * B * S * D * 2
                       + B * 6 * D * 4 + 2 * S * hd * 4)
    vmem1 = _vmem_limit(
        2 * (tq * D * xb + 2 * tq * hd * 4)          # x + cos/sin tiles (double-buffered)
        + 3 * 2 * (n_heads * tq * hd * 2)            # q/k/v output tiles (double-buffered)
        + 6 * D * 4 + D * 4 + D * 3 * D * 2)         # mods + ln1 + Wqkv (single-buffered)

    q3, k3, v3 = pl.pallas_call(
        functools.partial(_qkv_rope_kernel, n_heads=n_heads),
        out_shape=(qkv_shape, qkv_shape, qkv_shape),
        grid_spec=pltpu.PrefetchScalarGridSpec(
            num_scalar_prefetch=0,
            grid=(B, nq),
            in_specs=[
                pl.BlockSpec((None, tq, D), lambda b, si: (b, si, 0)),             # x tile
                pl.BlockSpec((tq, hd), lambda b, si: (si, 0)),                     # cos
                pl.BlockSpec((tq, hd), lambda b, si: (si, 0)),                     # sin (signed)
                pl.BlockSpec((None, 6, D), lambda b, si: (b, 0, 0),
                             pipeline_mode=pl.Buffered(1)),                        # adaLN rows
                pl.BlockSpec((1, D), lambda b, si: (0, 0),
                             pipeline_mode=pl.Buffered(1)),                        # ln1 weight
                pl.BlockSpec((D, 3 * D), lambda b, si: (0, 0),
                             pipeline_mode=pl.Buffered(1)),                        # Wqkv^T bf16
            ],
            out_specs=tuple(pl.BlockSpec((None, n_heads, tq, hd), qkv_idx)
                            for _ in range(3)),
        ),
        compiler_params=pltpu.CompilerParams(
            dimension_semantics=("parallel", "parallel"),
            vmem_limit_bytes=vmem1),
        cost_estimate=cost1,
    )(x, cos_hd, sin_signed, mods, ln1, wqkv)

    # ---- stage 2: flash attention (online softmax over kv tiles) + out-proj + gated residual ----
    cost2 = pl.CostEstimate(
        flops=4 * B * n_heads * S * S * hd + 2 * B * S * D * D + 8 * B * S * D,
        transcendentals=B * n_heads * S * S,
        bytes_accessed=B * S * D * 2 * (1 + 2 * nq) + 2 * B * S * D * xb
                       + D * D * 2 + B * 6 * D * 4)
    vmem2 = _vmem_limit(
        2 * (n_heads * tq * hd * 2 + 2 * n_heads * tk * hd * 2 + 2 * tq * D * xb)
        + 6 * D * 4 + D * D * 2                         # mods + Wout (single-buffered)
        + n_heads * tq * (hd + 2) * 4)                  # acc/m/l scratch

    x1 = pl.pallas_call(
        functools.partial(_attn_kernel, n_heads=n_heads, exp_in_bf16=exp_in_bf16),
        out_shape=jax.ShapeDtypeStruct((B, S, D), x.dtype),
        grid_spec=pltpu.PrefetchScalarGridSpec(
            num_scalar_prefetch=0,
            grid=(B, nq, nk),
            in_specs=[
                pl.BlockSpec((None, n_heads, tq, hd), lambda b, qi, ki: (b, 0, qi, 0)),  # q
                pl.BlockSpec((None, n_heads, tk, hd), lambda b, qi, ki: (b, 0, ki, 0)),  # k
                pl.BlockSpec((None, n_heads, tk, hd), lambda b, qi, ki: (b, 0, ki, 0)),  # v
                pl.BlockSpec((None, tq, D), lambda b, qi, ki: (b, qi, 0)),               # x (residual)
                pl.BlockSpec((None, 6, D), lambda b, qi, ki: (b, 0, 0),
                             pipeline_mode=pl.Buffered(1)),                              # adaLN rows
                pl.BlockSpec((D, D), lambda b, qi, ki: (0, 0),
                             pipeline_mode=pl.Buffered(1)),                              # Wout^T bf16
            ],
            out_specs=pl.BlockSpec((None, tq, D), lambda b, qi, ki: (b, qi, 0)),
            scratch_shapes=[
                pltpu.VMEM((n_heads, tq, 1), jnp.float32),    # running max
                pltpu.VMEM((n_heads, tq, 1), jnp.float32),    # running denominator
                pltpu.VMEM((n_heads, tq, hd), jnp.float32),   # running numerator
            ],
        ),
        compiler_params=pltpu.CompilerParams(
            dimension_semantics=("parallel", "parallel", "arbitrary"),
            vmem_limit_bytes=vmem2),
        cost_estimate=cost2,
    )(q3, k3, v3, x, mods, wout)

    # ---- stage 3: LN2 + modulate + MLP with hidden-dim streaming + gated residual ----
    cost3 = pl.CostEstimate(
        flops=4 * B * S * D * H4 + 12 * B * S * D,
        transcendentals=B * S * H4,
        bytes_accessed=2 * B * S * D * xb + B * nq * 2 * D * H4 * 2
                       + B * 6 * D * 4 + (H4 + 2 * D) * 4)
    vmem3 = _vmem_limit(
        2 * (2 * tq * D * xb + D * th * 2 + th * D * 2 + th * 4)   # x1/out + streamed W1/b1/W2
        + 6 * D * 4 + 2 * D * 4                                    # mods + ln2 + b2 (single-buf)
        + tq * D * (2 + 4))                                        # h2 (bf16) + acc (f32) scratch

    out = pl.pallas_call(
        _mlp_kernel,
        out_shape=jax.ShapeDtypeStruct((B, S, D), x.dtype),
        grid_spec=pltpu.PrefetchScalarGridSpec(
            num_scalar_prefetch=0,
            grid=(B, nq, nh),
            in_specs=[
                pl.BlockSpec((None, tq, D), lambda b, qi, hi: (b, qi, 0)),               # x1
                pl.BlockSpec((None, 6, D), lambda b, qi, hi: (b, 0, 0),
                             pipeline_mode=pl.Buffered(1)),                              # adaLN rows
                pl.BlockSpec((1, D), lambda b, qi, hi: (0, 0),
                             pipeline_mode=pl.Buffered(1)),                              # ln2 weight
                pl.BlockSpec((D, th), lambda b, qi, hi: (0, hi)),                        # W1 column block
                pl.BlockSpec((1, th), lambda b, qi, hi: (0, hi)),                        # b1 block
                pl.BlockSpec((th, D), lambda b, qi, hi: (hi, 0)),                        # W2 row block
                pl.BlockSpec((1, D), lambda b, qi, hi: (0, 0),
                             pipeline_mode=pl.Buffered(1)),                              # b2
            ],
            out_specs=pl.BlockSpec((None, tq, D), lambda b, qi, hi: (b, qi, 0)),
            scratch_shapes=[
                pltpu.VMEM((tq, D), jnp.bfloat16),   # modulated LN2 activations
                pltpu.VMEM((tq, D), jnp.float32),    # MLP output accumulator
            ],
        ),
        compiler_params=pltpu.CompilerParams(
            dimension_semantics=("parallel", "parallel", "arbitrary"),
            vmem_limit_bytes=vmem3),
        cost_estimate=cost3,
    )(x1, mods, ln2, w1, b1, w2, b2)
    return out


# ------------------------------ pure-JAX reference (f32) ------------------------------

def reference(x, c, cos_hd, sin_hd, params, n_heads):
    B, S, D = x.shape
    hd = D // n_heads
    mods = (c[:, 0, :] @ params["w_ada_t"] + params["b_ada"][0])[:, None, :]  # (B,1,6D)
    (shift_msa, scale_msa, gate_msa,
     shift_mlp, scale_mlp, gate_mlp) = jnp.split(mods, 6, axis=2)

    def ln(v, w):
        mu = jnp.mean(v, -1, keepdims=True)
        var = jnp.mean((v - mu) ** 2, -1, keepdims=True)
        return (v - mu) / jnp.sqrt(var + 1e-5) * w

    x_skip = x
    h = ln(x, params["ln1_w"][0]) * (1 + scale_msa) + shift_msa
    qkv = (h @ params["wqkv_t"]).reshape(B, S, 3, n_heads, hd)
    cos = cos_hd[None, :, None, :]
    sin = sin_hd[None, :, None, :]

    def rot_half(t):
        t1, t2 = t[..., :hd // 2], t[..., hd // 2:]
        return jnp.concatenate([-t2, t1], axis=-1)

    q, k, v = qkv[:, :, 0], qkv[:, :, 1], qkv[:, :, 2]
    q = q * cos + rot_half(q) * sin
    k = k * cos + rot_half(k) * sin
    s = jnp.einsum("bqhd,bkhd->bhqk", q, k) / math.sqrt(hd)
    p = jax.nn.softmax(s, axis=-1)
    attn = jnp.einsum("bhqk,bkhd->bqhd", p, v).reshape(B, S, D)
    attn = attn @ params["wout_t"]
    x1 = x_skip + gate_msa * attn
    h2 = ln(x1, params["ln2_w"][0]) * (1 + scale_mlp) + shift_mlp
    m = h2 @ params["w1_t"] + params["b1"][0]
    c0 = math.sqrt(2.0 / math.pi)
    m = 0.5 * m * (1.0 + jnp.tanh(c0 * (m + 0.044715 * m ** 3)))
    m = m @ params["w2_t"] + params["b2"][0]
    return x1 + gate_mlp * m


if __name__ == "__main__":
    # Small but alignment-friendly shapes: head_dim = 128 so q/k/v tiles are lane-dense and
    # RoPE rolls operate on full vregs; tq=tk=64 gives 2 kv tiles (exercises the online
    # softmax) and even parallel extents; block_h=512 gives 2 MLP hidden-dim steps.
    B, S, D, H, C = 2, 128, 256, 2, 64
    mlp_ratio = 4
    hd = D // H

    key = jax.random.PRNGKey(0)
    keys = jax.random.split(key, 12)

    def init(k, shape, scale=0.05):
        return scale * jax.random.normal(k, shape, dtype=jnp.float32)

    params_f32 = {
        "w_ada_t": init(keys[0], (C, 6 * D)),            # adaLN_modulation_ar.weight^T
        "b_ada":   init(keys[1], (1, 6 * D)),            # adaLN_modulation_ar.bias
        "ln1_w":   1.0 + init(keys[2], (1, D)),          # norm1_ar.weight
        "ln2_w":   1.0 + init(keys[3], (1, D)),          # norm2_ar.weight
        "wqkv_t":  init(keys[4], (D, 3 * D)),            # attn_qkv.weight^T (no bias)
        "wout_t":  init(keys[5], (D, D)),                # attn_out.weight^T (no bias)
        "w1_t":    init(keys[6], (D, mlp_ratio * D)),    # mlp[0].weight^T
        "b1":      init(keys[7], (1, mlp_ratio * D)),    # mlp[0].bias
        "w2_t":    init(keys[8], (mlp_ratio * D, D)),    # mlp[2].weight^T
        "b2":      init(keys[9], (1, D)),                # mlp[2].bias
    }

    x = jax.random.normal(keys[10], (B, S, D), dtype=jnp.float32)
    c = jax.random.normal(keys[11], (B, 1, C), dtype=jnp.float32)

    # rotary cos/sin exactly as SEDD's Rotary module (base 10000), per head_dim
    inv_freq = 1.0 / (10000.0 ** (jnp.arange(0, hd, 2, dtype=jnp.float32) / hd))
    t = jnp.arange(S, dtype=jnp.float32)
    freqs = jnp.outer(t, inv_freq)                       # (S, hd/2)
    emb = jnp.concatenate([freqs, freqs], axis=-1)       # (S, hd)
    cos_hd, sin_hd = jnp.cos(emb), jnp.sin(emb)

    params = prepare_params(params_f32)   # hoisted one-time weight casts (bf16 / f32)

    out = ada_transformer_block(x, c, cos_hd, sin_hd, params, H,
                                block_q=64, block_kv=64, block_h=512)
    out = jax.block_until_ready(out)

    ref = reference(x, c, cos_hd, sin_hd, params_f32, H)
    assert out.shape == (B, S, D)
    np.testing.assert_allclose(np.asarray(out), np.asarray(ref), rtol=2e-2, atol=2e-2)

    print("KERNEL_OK")
</pallas_src>

<mosaic_0001>
module attributes {stable_mosaic.version = 11 : i64} {
  func.func @_qkv_rope_kernel(%arg0: i32, %arg1: i32, %arg2: memref<1x64x256xf32, #tpu.memory_space<vmem>>, %arg3: memref<64x128xf32, #tpu.memory_space<vmem>>, %arg4: memref<64x128xf32, #tpu.memory_space<vmem>>, %arg5: memref<1x6x256xf32, #tpu.memory_space<vmem>>, %arg6: memref<1x256xf32, #tpu.memory_space<vmem>>, %arg7: memref<256x768xbf16, #tpu.memory_space<vmem>>, %arg8: memref<1x2x64x128xbf16, #tpu.memory_space<vmem>>, %arg9: memref<1x2x64x128xbf16, #tpu.memory_space<vmem>>, %arg10: memref<1x2x64x128xbf16, #tpu.memory_space<vmem>>) attributes {dimension_semantics = [#tpu.dimension_semantics<parallel>, #tpu.dimension_semantics<parallel>], iteration_bounds = array<i64: 2, 2>, scalar_prefetch = 0 : i64, scratch_operands = 0 : i64, tpu.core_type = #tpu.core_type<tc>, window_params = [{transform_indices = @transform_0, window_bounds = array<i64: 1, 64, 256>}, {transform_indices = @transform_1, window_bounds = array<i64: 64, 128>}, {transform_indices = @transform_2, window_bounds = array<i64: 64, 128>}, {pipeline_mode = #tpu.pipeline_mode<synchronous>, transform_indices = @transform_3, window_bounds = array<i64: 1, 6, 256>}, {pipeline_mode = #tpu.pipeline_mode<synchronous>, transform_indices = @transform_4, window_bounds = array<i64: 1, 256>}, {pipeline_mode = #tpu.pipeline_mode<synchronous>, transform_indices = @transform_5, window_bounds = array<i64: 256, 768>}, {transform_indices = @transform_6, window_bounds = array<i64: 1, 2, 64, 128>}, {transform_indices = @transform_7, window_bounds = array<i64: 1, 2, 64, 128>}, {transform_indices = @transform_8, window_bounds = array<i64: 1, 2, 64, 128>}]} {
    %c0 = arith.constant 0 : index
    %c0_0 = arith.constant 0 : index
    %c0_1 = arith.constant 0 : index
    %0 = vector.load %arg5[%c0, %c0_0, %c0_1] : memref<1x6x256xf32, #tpu.memory_space<vmem>>, vector<1x1x256xf32>
    %1 = vector.shape_cast %0 : vector<1x1x256xf32> to vector<1x256xf32>
    %c0_2 = arith.constant 0 : index
    %c1 = arith.constant 1 : index
    %c0_3 = arith.constant 0 : index
    %2 = vector.load %arg5[%c0_2, %c1, %c0_3] : memref<1x6x256xf32, #tpu.memory_space<vmem>>, vector<1x1x256xf32>
    %3 = vector.shape_cast %2 : vector<1x1x256xf32> to vector<1x256xf32>
    %c0_4 = arith.constant 0 : index
    %c0_5 = arith.constant 0 : index
    %c0_6 = arith.constant 0 : index
    %4 = vector.load %arg2[%c0_4, %c0_5, %c0_6] : memref<1x64x256xf32, #tpu.memory_space<vmem>>, vector<1x64x256xf32>
    %5 = vector.shape_cast %4 : vector<1x64x256xf32> to vector<64x256xf32>
    %c0_7 = arith.constant 0 : index
    %c0_8 = arith.constant 0 : index
    %6 = vector.load %arg6[%c0_7, %c0_8] : memref<1x256xf32, #tpu.memory_space<vmem>>, vector<1x256xf32>
    %cst = arith.constant dense<0.000000e+00> : vector<64xf32>
    %7 = vector.multi_reduction <add>, %5, %cst [1] : vector<64x256xf32> to vector<64xf32>
    %8 = vector.shape_cast %7 : vector<64xf32> to vector<64x1xf32>
    %cst_9 = arith.constant 2.560000e+02 : f32
    %9 = vector.broadcast %cst_9 : f32 to vector<64x1xf32>
    %10 = arith.divf %8, %9 : vector<64x1xf32>
    %11 = vector.broadcast %10 : vector<64x1xf32> to vector<64x256xf32>
    %12 = arith.subf %5, %11 : vector<64x256xf32>
    %13 = arith.mulf %12, %12 : vector<64x256xf32>
    %cst_10 = arith.constant dense<0.000000e+00> : vector<64xf32>
    %14 = vector.multi_reduction <add>, %13, %cst_10 [1] : vector<64x256xf32> to vector<64xf32>
    %15 = vector.shape_cast %14 : vector<64xf32> to vector<64x1xf32>
    %cst_11 = arith.constant 2.560000e+02 : f32
    %16 = vector.broadcast %cst_11 : f32 to vector<64x1xf32>
    %17 = arith.divf %15, %16 : vector<64x1xf32>
    %18 = vector.broadcast %10 : vector<64x1xf32> to vector<64x256xf32>
    %19 = arith.subf %5, %18 : vector<64x256xf32>
    %cst_12 = arith.constant 9.99999974E-6 : f32
    %20 = vector.broadcast %cst_12 : f32 to vector<64x1xf32>
    %21 = arith.addf %17, %20 : vector<64x1xf32>
    %22 = math.rsqrt %21 : vector<64x1xf32>
    %23 = vector.broadcast %22 : vector<64x1xf32> to vector<64x256xf32>
    %24 = arith.mulf %19, %23 : vector<64x256xf32>
    %25 = vector.broadcast %6 : vector<1x256xf32> to vector<64x256xf32>
    %26 = arith.mulf %24, %25 : vector<64x256xf32>
    %cst_13 = arith.constant 1.000000e+00 : f32
    %27 = vector.broadcast %cst_13 : f32 to vector<1x256xf32>
    %28 = arith.addf %27, %3 : vector<1x256xf32>
    %29 = vector.broadcast %28 : vector<1x256xf32> to vector<64x256xf32>
    %30 = arith.mulf %26, %29 : vector<64x256xf32>
    %31 = vector.broadcast %1 : vector<1x256xf32> to vector<64x256xf32>
    %32 = arith.addf %30, %31 : vector<64x256xf32>
    %33 = arith.truncf %32 : vector<64x256xf32> to vector<64x256xbf16>
    %c0_14 = arith.constant 0 : index
    %c0_15 = arith.constant 0 : index
    %34 = vector.load %arg7[%c0_14, %c0_15] : memref<256x768xbf16, #tpu.memory_space<vmem>>, vector<256x768xbf16>
    %cst_16 = arith.constant dense<0.000000e+00> : vector<64x768xf32>
    %35 = tpu.matmul %33, %34, %cst_16 {dimension_numbers = #tpu.dot_dimension_numbers<[1], [0], [0], [1], [0, 0, 1, 1], [], []>} : vector<64x256xbf16>, vector<256x768xbf16>, vector<64x768xf32> -> vector<64x768xf32>
    %c0_17 = arith.constant 0 : index
    %c0_18 = arith.constant 0 : index
    %36 = vector.load %arg3[%c0_17, %c0_18] : memref<64x128xf32, #tpu.memory_space<vmem>>, vector<64x128xf32>
    %37 = vector.shape_cast %36 : vector<64x128xf32> to vector<1x64x128xf32>
    %c0_19 = arith.constant 0 : index
    %c0_20 = arith.constant 0 : index
    %38 = vector.load %arg4[%c0_19, %c0_20] : memref<64x128xf32, #tpu.memory_space<vmem>>, vector<64x128xf32>
    %39 = vector.shape_cast %38 : vector<64x128xf32> to vector<1x64x128xf32>
    %40 = vector.extract_strided_slice %35 {offsets = [0, 0], sizes = [64, 256], strides = [1, 1]} : vector<64x768xf32> to vector<64x256xf32>
    %41 = vector.extract_strided_slice %40 {offsets = [0, 0], sizes = [64, 128], strides = [1, 1]} : vector<64x256xf32> to vector<64x128xf32>
    %42 = vector.extract_strided_slice %40 {offsets = [0, 128], sizes = [64, 128], strides = [1, 1]} : vector<64x256xf32> to vector<64x128xf32>
    %43 = vector.shape_cast %41 : vector<64x128xf32> to vector<1x64x128xf32>
    %44 = vector.shape_cast %42 : vector<64x128xf32> to vector<1x64x128xf32>
    %45 = tpu.concatenate %43, %44 in 0 : vector<1x64x128xf32>, vector<1x64x128xf32> -> vector<2x64x128xf32>
    %46 = vector.broadcast %37 : vector<1x64x128xf32> to vector<2x64x128xf32>
    %47 = arith.mulf %45, %46 : vector<2x64x128xf32>
    %c64_i32 = arith.constant 64 : i32
    %48 = tpu.dynamic_rotate %45 by %c64_i32 dim 2 : vector<2x64x128xf32>, i32 -> vector<2x64x128xf32>
    %49 = vector.broadcast %39 : vector<1x64x128xf32> to vector<2x64x128xf32>
    %50 = arith.mulf %48, %49 : vector<2x64x128xf32>
    %51 = arith.addf %47, %50 : vector<2x64x128xf32>
    %52 = vector.extract_strided_slice %35 {offsets = [0, 256], sizes = [64, 256], strides = [1, 1]} : vector<64x768xf32> to vector<64x256xf32>
    %53 = vector.extract_strided_slice %52 {offsets = [0, 0], sizes = [64, 128], strides = [1, 1]} : vector<64x256xf32> to vector<64x128xf32>
    %54 = vector.extract_strided_slice %52 {offsets = [0, 128], sizes = [64, 128], strides = [1, 1]} : vector<64x256xf32> to vector<64x128xf32>
    %55 = vector.shape_cast %53 : vector<64x128xf32> to vector<1x64x128xf32>
    %56 = vector.shape_cast %54 : vector<64x128xf32> to vector<1x64x128xf32>
    %57 = tpu.concatenate %55, %56 in 0 : vector<1x64x128xf32>, vector<1x64x128xf32> -> vector<2x64x128xf32>
    %58 = vector.broadcast %37 : vector<1x64x128xf32> to vector<2x64x128xf32>
    %59 = arith.mulf %57, %58 : vector<2x64x128xf32>
    %c64_i32_21 = arith.constant 64 : i32
    %60 = tpu.dynamic_rotate %57 by %c64_i32_21 dim 2 : vector<2x64x128xf32>, i32 -> vector<2x64x128xf32>
    %61 = vector.broadcast %39 : vector<1x64x128xf32> to vector<2x64x128xf32>
    %62 = arith.mulf %60, %61 : vector<2x64x128xf32>
    %63 = arith.addf %59, %62 : vector<2x64x128xf32>
    %64 = vector.extract_strided_slice %35 {offsets = [0, 512], sizes = [64, 256], strides = [1, 1]} : vector<64x768xf32> to vector<64x256xf32>
    %65 = vector.extract_strided_slice %64 {offsets = [0, 0], sizes = [64, 128], strides = [1, 1]} : vector<64x256xf32> to vector<64x128xf32>
    %66 = vector.extract_strided_slice %64 {offsets = [0, 128], sizes = [64, 128], strides = [1, 1]} : vector<64x256xf32> to vector<64x128xf32>
    %67 = vector.shape_cast %65 : vector<64x128xf32> to vector<1x64x128xf32>
    %68 = vector.shape_cast %66 : vector<64x128xf32> to vector<1x64x128xf32>
    %69 = tpu.concatenate %67, %68 in 0 : vector<1x64x128xf32>, vector<1x64x128xf32> -> vector<2x64x128xf32>
    %cst_22 = arith.constant 0.0883883461 : f32
    %70 = vector.broadcast %cst_22 : f32 to vector<2x64x128xf32>
    %71 = arith.mulf %51, %70 : vector<2x64x128xf32>
    %72 = arith.truncf %71 : vector<2x64x128xf32> to vector<2x64x128xbf16>
    %c0_23 = arith.constant 0 : index
    %c0_24 = arith.constant 0 : index
    %c0_25 = arith.constant 0 : index
    %c0_26 = arith.constant 0 : index
    %73 = vector.load %arg8[%c0_23, %c0_24, %c0_25, %c0_26] : memref<1x2x64x128xbf16, #tpu.memory_space<vmem>>, vector<1x2x64x128xbf16>
    %74 = vector.shape_cast %73 : vector<1x2x64x128xbf16> to vector<2x64x128xbf16>
    %75 = vector.shape_cast %72 : vector<2x64x128xbf16> to vector<1x2x64x128xbf16>
    tpu.vector_store %arg8[%c0_23, %c0_24, %c0_25, %c0_26], %75 {strides = array<i32>} : memref<1x2x64x128xbf16, #tpu.memory_space<vmem>>, vector<1x2x64x128xbf16>,
    %76 = arith.truncf %63 : vector<2x64x128xf32> to vector<2x64x128xbf16>
    %c0_27 = arith.constant 0 : index
    %c0_28 = arith.constant 0 : index
    %c0_29 = arith.constant 0 : index
    %c0_30 = arith.constant 0 : index
    %77 = vector.load %arg9[%c0_27, %c0_28, %c0_29, %c0_30] : memref<1x2x64x128xbf16, #tpu.memory_space<vmem>>, vector<1x2x64x128xbf16>
    %78 = vector.shape_cast %77 : vector<1x2x64x128xbf16> to vector<2x64x128xbf16>
    %79 = vector.shape_cast %76 : vector<2x64x128xbf16> to vector<1x2x64x128xbf16>
    tpu.vector_store %arg9[%c0_27, %c0_28, %c0_29, %c0_30], %79 {strides = array<i32>} : memref<1x2x64x128xbf16, #tpu.memory_space<vmem>>, vector<1x2x64x128xbf16>,
    %80 = arith.truncf %69 : vector<2x64x128xf32> to vector<2x64x128xbf16>
    %c0_31 = arith.constant 0 : index
    %c0_32 = arith.constant 0 : index
    %c0_33 = arith.constant 0 : index
    %c0_34 = arith.constant 0 : index
    %81 = vector.load %arg10[%c0_31, %c0_32, %c0_33, %c0_34] : memref<1x2x64x128xbf16, #tpu.memory_space<vmem>>, vector<1x2x64x128xbf16>
    %82 = vector.shape_cast %81 : vector<1x2x64x128xbf16> to vector<2x64x128xbf16>
    %83 = vector.shape_cast %80 : vector<2x64x128xbf16> to vector<1x2x64x128xbf16>
    tpu.vector_store %arg10[%c0_31, %c0_32, %c0_33, %c0_34], %83 {strides = array<i32>} : memref<1x2x64x128xbf16, #tpu.memory_space<vmem>>, vector<1x2x64x128xbf16>,
    return
  }
  func.func @transform_0(%arg0: i32, %arg1: i32) -> (i32, i32, i32) {
    %c0_i32 = arith.constant 0 : i32
    %c0_i32_0 = arith.constant 0 : i32
    return %arg0, %arg1, %c0_i32 : i32, i32, i32
  }
  func.func @transform_1(%arg0: i32, %arg1: i32) -> (i32, i32) {
    %c0_i32 = arith.constant 0 : i32
    %c0_i32_0 = arith.constant 0 : i32
    return %arg1, %c0_i32 : i32, i32
  }
  func.func @transform_2(%arg0: i32, %arg1: i32) -> (i32, i32) {
    %c0_i32 = arith.constant 0 : i32
    %c0_i32_0 = arith.constant 0 : i32
    return %arg1, %c0_i32 : i32, i32
  }
  func.func @transform_3(%arg0: i32, %arg1: i32) -> (i32, i32, i32) {
    %c0_i32 = arith.constant 0 : i32
    %c0_i32_0 = arith.constant 0 : i32
    %c0_i32_1 = arith.constant 0 : i32
    return %arg0, %c0_i32, %c0_i32_0 : i32, i32, i32
  }
  func.func @transform_4(%arg0: i32, %arg1: i32) -> (i32, i32) {
    %c0_i32 = arith.constant 0 : i32
    %c0_i32_0 = arith.constant 0 : i32
    %c0_i32_1 = arith.constant 0 : i32
    return %c0_i32, %c0_i32_0 : i32, i32
  }
  func.func @transform_5(%arg0: i32, %arg1: i32) -> (i32, i32) {
    %c0_i32 = arith.constant 0 : i32
    %c0_i32_0 = arith.constant 0 : i32
    %c0_i32_1 = arith.constant 0 : i32
    return %c0_i32, %c0_i32_0 : i32, i32
  }
  func.func @transform_6(%arg0: i32, %arg1: i32) -> (i32, i32, i32, i32) {
    %c0_i32 = arith.constant 0 : i32
    %c0_i32_0 = arith.constant 0 : i32
    %c0_i32_1 = arith.constant 0 : i32
    return %arg0, %c0_i32, %arg1, %c0_i32_0 : i32, i32, i32, i32
  }
  func.func @transform_7(%arg0: i32, %arg1: i32) -> (i32, i32, i32, i32) {
    %c0_i32 = arith.constant 0 : i32
    %c0_i32_0 = arith.constant 0 : i32
    %c0_i32_1 = arith.constant 0 : i32
    return %arg0, %c0_i32, %arg1, %c0_i32_0 : i32, i32, i32, i32
  }
  func.func @transform_8(%arg0: i32, %arg1: i32) -> (i32, i32, i32, i32) {
    %c0_i32 = arith.constant 0 : i32
    %c0_i32_0 = arith.constant 0 : i32
    %c0_i32_1 = arith.constant 0 : i32
    return %arg0, %c0_i32, %arg1, %c0_i32_0 : i32, i32, i32, i32
  }
}

</mosaic_0001>

<bundles_post_ra>
// kernel: tpu_custom_call.1
= control target key start
LH: loop header
LB: loop body
LE: loop exit
PB: predicated region body
PF: predicated region fallthrough
CT: control target
= control target key end

     0   :  { %s4293_s0 = inlined_call_operand.hbm [shape: f32[2,128,256], index: 0, kind: input, shape index: {}]   ;;  %s4294_s1 = inlined_call_operand.hbm [shape: f32[128,128], index: 1, kind: input, shape index: {}]   ;;  %s4295_s2 = inlined_call_operand.hbm [shape: f32[128,128], index: 2, kind: input, shape index: {}]   ;;  %s4296_s3 = inlined_call_operand.vmem [shape: f32[2,6,256], index: 3, kind: input, shape index: {}]   ;;  %s4297_s4 = inlined_call_operand.vmem [shape: f32[1,256], index: 4, kind: input, shape index: {}]   ;;  %s4298_s5 = inlined_call_operand.hbm [shape: bf16[256,768], index: 5, kind: input, shape index: {}]   ;;  %s4299_s6 = inlined_call_operand.hbm [shape: bf16[2,2,128,128], index: 6, kind: output, shape index: {0}]   ;;  %s4300_s7 = inlined_call_operand.hbm [shape: bf16[2,2,128,128], index: 7, kind: output, shape index: {1}]   ;;  %s4301_s8 = inlined_call_operand.hbm [shape: bf16[2,2,128,128], index: 8, kind: output, shape index: {2}]  }
   0x1   :  { %4328 = sst [smem:[#allocation36_spill]] %s4294_s1 }
   0x2   :  { %4329 = sst [smem:[#allocation37_spill]] %s4296_s3 }
   0x3   :  { %4330 = sst [smem:[#allocation38_spill]] %s4297_s4 }
   0x4   :  { %4331 = sst [smem:[#allocation39_spill]] %s4298_s5 }
   0x5   :  { %4332 = sst [smem:[#allocation40_spill]] %s4299_s6 }
   0x6   :  { %4333 = sst [smem:[#allocation41_spill]] %s4300_s7 }
   0x7   :  { %4334 = sst [smem:[#allocation42_spill]] %s4301_s8 }
   0x8   :  { %14 = vsyncpa [#allocation3], 0 }
   0x9   :  { %16 = vsyncpa [#allocation3 + $0x1], 0 }
   0xa   :  { %17 = vsyncpa [#allocation6], 0 }
   0xb   :  { %19 = vsyncpa [#allocation6 + $0x1], 0 }
   0xc   :  { %20 = vsyncpa [#allocation9], 0 }
   0xd   :  { %21 = vsyncpa [#allocation4], 0 }
   0xe   :  { %23 = vsyncpa [#allocation4 + $0x1], 0 }
   0xf   :  { %24 = vsyncpa [#allocation12], 0 }
  0x10   :  { %26 = vsyncpa [#allocation12 + $0x1], 0  ;;  %s3375_s27 = smov 0   ;;  %s3377_s28 = smov 0  }
  0x11   :  { %s3379_s29 = smov 0   ;;  %s3381_s30 = smov 0  }
  0x12   :  { %s3383_s9 = smov 0   ;;  %s3385_s10 = smov 0  }
  0x13   :  { %s3387_s11 = smov 0   ;;  %s3389_s12 = smov 0  }
  0x14   :  { %s3391_s13 = smov 0   ;;  %s3393_s14 = smov 0  }
  0x15   :  { %s3395_s15 = smov 0  }
  0x16 LB: > { %4335 = sst [smem:[#allocation25_spill]] %s3260_s28  ;;  %s41_s16 = sadd.s32 1, %s3288_s13  ;;  %s3296_s15 = sphi %s3395_s15, %s32_s15   ;;  %s3292_s14 = sphi %s3393_s14, %s4401_s14   ;;  %s3288_s13 = sphi %s3391_s13, %s4400_s13   ;;  %s3284_s12 = sphi %s3389_s12, %s4399_s12   ;;  %s3280_s11 = sphi %s3387_s11, %s4398_s11   ;;  %s3276_s10 = sphi %s3385_s10, %s4397_s10   ;;  %s3272_s9 = sphi %s3383_s9, %s4396_s9   ;;  %s3268_s30 = sphi %s3381_s30, %s4395_s30   ;;  %s3264_s29 = sphi %s3379_s29, %s4393_s29   ;;  %s3260_s28 = sphi %s3377_s28, %s4392_s28   ;;  %s3256_s27 = sphi %s3375_s27, %s4391_s27  }
  0x17   : > { %4336 = sst [smem:[#allocation26_spill]] %s3264_s29  ;;  %p4306_p0 = scmp.eq.s32.totalorder %s3296_s15, 0 }
  0x18   : > { %4337 = sst [smem:[#allocation27_spill]] %s3268_s30  ;;  %p3432_p1 = scmp.ge.s32.totalorder %s41_s16, 2 }
  0x19   : > { %4338 = sst [smem:[#allocation28_spill]] %s3280_s11  ;;  %s79_s18 = sadd.s32 1, %s3264_s29 }
  0x1a   : > { %4339 = sst [smem:[#allocation29_spill]] %s3284_s12  ;;  %p86_p2 = scmp.ne.s32.totalorder %s3264_s29, %s3260_s28 }
  0x1b   : > { %s4340_s17 = scalar_select %p3432_p1, 1, 0 }
  0x1c   : > { %s4403_s16 = smov (%p3432_p1, %s41_s16), 0  ;;  %p88_p3 = por %p86_p2, %p4306_p0 }
  0x1d   : > { %4341 = sst [smem:[#allocation30_spill]] %s4403_s16  ;;  %p4305_p4 = scmp.lt.s32.totalorder %s3296_s15, 4 }
  0x1e   : > { %s3448_s19 = ssub.s32 %s3288_s13, %s4403_s16  ;;  %s342_s20 = sand.u32 1, %s3296_s15  }
  0x1f   : > { %p77_p5 = scmp.eq.s32.totalorder %s3448_s19, 0  ;;  %s344_s21 = sand.u32 1, %s3264_s29  }
  0x20   : > { %s4303_s22 = sshll.u32 %s3288_s13, 10  ;;  %s3457_s24 = sshll.u32 %s344_s21, 6 }
  0x21   : > { %s3455_s23 = scalar_select %p77_p5, %s3264_s29, %s79_s18  }
  0x22   : > { %s4343_s1 = sld [smem:[#allocation36_spill]]  ;;  %p3468_p6 = pnand %p4305_p4, %p88_p3 }
  0x23   : > { %4342 = sst [smem:[#allocation31_spill]] %s3455_s23  ;;  %s346_s18 = scalar_lea.vmem [#allocation5], %s3457_s24 }
  0x24   : > { %s4344_s16 = scalar_select %p3468_p6, 1, 0 }
  0x25   : > { %s353_s21 = sshll.u32 %s346_s18, 4  ;;  %s3475_s23 = scalar_lea.sflag [#allocation6], %s342_s20  ;;  %s3473_s21 = int_to_ptr.vmem [resolvable:$true] %s353_s21 }
  0x26   : > { %p4307_p8 = pneg %p3468_p6 }
  0x28   : > { %s3464_s8 = scalar_lea.hbm %s4343_s1, %s4303_s22  ;;  %s3077_s29 = scalar_lea.hbm %s4343_s1, 2048 }
  0x29   : > { %s3072_s25 = scalar_lea.hbm %s3464_s8, 1024  ;;  %p3078_p11 = scmp.lt.u32.totalorder %s3464_s8, %s4343_s1 }
  0x2a   : > { %p3073_p7 = scmp.ne.s32.totalorder %s3464_s8, %s3072_s25  ;;  %p3079_p12 = scmp.lt.u32.totalorder %s3077_s29, %s3072_s25 }
  0x2b   : > { %p3081_p2 = scmp.lt.u32.totalorder %s3072_s25, %s3464_s8 }
  0x2c   : > { %p3075_p9 = pnand %p4307_p8, %p3073_p7  ;;  %p3080_p13 = por %p3079_p12, %p3078_p11 }
  0x2e   : > { %p3076_p10 = pneg %p3075_p9  ;;  %p3082_p3 = por %p3081_p2, %p3080_p13 }
  0x30   : > { %p3083_p5 = pnand %p3082_p3, %p3076_p10 }
  0x32   : > { %3086 = shalt.err (!%p3083_p5)
}
  0x33   : > { %s3087_s20 = scalar_lea.vmem %s3473_s21, 1024  ;;  %s3298_s22 = smov [#allocation5]  }
  0x34   : > { %p3088_p7 = scmp.ne.s32.totalorder %s3473_s21, %s3087_s20  ;;  %s3092_s18 = sshll.u32 %s3298_s22, 4  ;;  %s3093_s18 = int_to_ptr.vmem [resolvable:$false] %s3092_s18 }
  0x35   : > { %s3094_s6 = scalar_lea.vmem %s3093_s18, 2048  ;;  %p3095_p0 = scmp.lt.s32.totalorder %s3473_s21, %s3093_s18 }
  0x36   : > { %p3090_p9 = pnand %p3088_p7, %p4307_p8  ;;  %p3096_p11 = scmp.lt.s32.totalorder %s3094_s6, %s3087_s20 }
  0x38   : > { %p3091_p4 = pneg %p3090_p9  ;;  %p3097_p12 = por %p3096_p11, %p3095_p0 }
  0x3a   : > { %p3098_p13 = pnand %p3097_p12, %p3091_p4 }
  0x3c   : > { %3101 = shalt.err (!%p3098_p13)
}
  0x3d   : > { %s4309_s7 = smov 128   ;;  %s4310_s29 = smov 8  }
  0x3e   : > { %2777 = dma.hbm_to_vmem [thread:$0]  (!%p3468_p6), %s3464_s8, 1024, %s3473_s21, %s3475_s23, %s4309_s7, %s4309_s7, %s4310_s29  }
  0x3f   : > { %s4345_s25 = sshll.u32 %s3288_s13, 10  ;;  %s367_s18 = scalar_lea.vmem [#allocation7], %s3457_s24 }
  0x40   : > { %s3511_s22 = scalar_lea.hbm %s4295_s2, %s4345_s25  ;;  %s374_s6 = sshll.u32 %s367_s18, 4  ;;  %s3514_s6 = int_to_ptr.vmem [resolvable:$true] %s374_s6 }
  0x41   : > { %s3517_s1 = sadd.s32 4294967295, %s3296_s15   ;;  %s4308_s11 = sadd.s32 4294967294, %s3296_s15  }
  0x42   : > { %4346 = sst [smem:[#allocation32_spill]] %s3517_s1  ;;  %p66_p0 = scmp.ne.s32.totalorder %s3272_s9, %s3268_s30 }
  0x43   : > { %p4313_p4 = scmp.eq.s32.totalorder %s3517_s1, 0  ;;  %p92_p10 = scmp.ne.s32.totalorder %s3260_s28, %s3256_s27 }
  0x44   : > { %p218_p3 = scmp.eq.s32.totalorder %s4308_s11, 3  ;;  %p2325_p11 = scmp.ge.s32.totalorder %s3296_s15, 1 }
  0x45   : > { %p3530_p5 = por %p4313_p4, %p66_p0  ;;  %p3536_p7 = por %p92_p10, %p4313_p4 }
  0x46   : > { %p3540_p9 = por %p218_p3, %p66_p0  ;;  %p281_p12 = scmp.lt.s32.totalorder %s3296_s15, 5 }
  0x47   : > { %s4347_s8 = scalar_select %p3530_p5, 1, 0 }
  0x48   : > { %s4348_s24 = scalar_select %p3536_p7, 1, 0 }
  0x49   : > { %s4350_s21 = scalar_select %p3540_p9, 1, 0 }
  0x4a   : > { %4349 = sst [smem:[#allocation33_spill]] %s4348_s24  ;;  %p3546_p13 = pnand %p2325_p11, %p281_p12 }
  0x4b   : > { %4351 = sst [smem:[#allocation34_spill]] %s4350_s21  ;;  %s3301_s25 = smov [#allocation8]  }
  0x4c   : > { %s4352_s27 = scalar_select %p3546_p13, 1, 0 }
  0x4d   : > { %s304_s26 = sshll.u32 %s3301_s25, 4  ;;  %p2767_p8 = pneg %p3546_p13  ;;  %s305_s26 = int_to_ptr.vmem [resolvable:$true] %s304_s26 }
  0x4e   : > { %s44_s18 = sadd.s32 1, %s3292_s14  ;;  %s4354_s5 = sld [smem:[#allocation39_spill]] }
  0x4f   : > { %p3554_p10 = pnand %p2767_p8, %p4313_p4 }
  0x51   : > { %p3104_p11 = pneg %p3554_p10 }
  0x54   : > { %s3102_s21 = scalar_lea.hbm %s4354_s5, 12288 }
  0x55   : > { %p3103_p3 = scmp.ne.s32.totalorder %s4354_s5, %s3102_s21  ;;  %p3109_p8 = scmp.lt.u32.totalorder %s3102_s21, %s4354_s5 }
  0x57   : > { %p3105_p12 = pnand %p3104_p11, %p3103_p3 }
  0x59   : > { %p3106_p2 = pneg %p3105_p12 }
  0x5b   : > { %p3111_p4 = pnand %p3109_p8, %p3106_p2 }
  0x5d   : > { %3114 = shalt.err (!%p3111_p4)
}
  0x5e   : > { %s3115_s11 = scalar_lea.vmem %s305_s26, 12288  ;;  %p3123_p5 = scmp.lt.s32.totalorder %s305_s26, %s305_s26 }
  0x5f   : > { %p3116_p0 = scmp.ne.s32.totalorder %s305_s26, %s3115_s11  ;;  %p3124_p13 = scmp.lt.s32.totalorder %s3115_s11, %s3115_s11 }
  0x61   : > { %p3118_p9 = pnand %p3116_p0, %p3104_p11  ;;  %p3125_p6 = por %p3124_p13, %p3123_p5 }
  0x63   : > { %p3119_p7 = pneg %p3118_p9 }
  0x65   : > { %p3126_p1 = pnand %p3125_p6, %p3119_p7 }
  0x67   : > { %3129 = shalt.err (!%p3126_p1)
}
  0x68   : > { %s3302_s4 = smov 384   ;;  %s3303_s3 = smov 24  }
  0x69   : > { %2770 = dma.hbm_to_vmem [thread:$0]  (!%p3554_p10), %s4354_s5, 12288, %s305_s26, [#allocation9], %s3302_s4, %s3302_s4, %s3303_s3  }
  0x6a   : > { %p4355_p1 = scmp.ne.s32.totalorder %s4340_s17, 0  ;;  %p4356_p6 = scmp.ne.s32.totalorder %s3276_s10, %s3272_s9 }
  0x6b   : > { %p4357_p4 = scmp.eq.s32.totalorder %s3296_s15, 0  ;;  %p4360_p7 = scmp.eq.s32.totalorder %s3517_s1, 3 }
  0x6c   : > { %s4405_s18 = smov (!%p4355_p1, %s44_s18), %s3292_s14  ;;  %p4359_p5 = pmov %p4356_p6 }
  0x6d   : > { %p3586_p2 = por %p4357_p4, %p4356_p6  ;;  %p46_p13 = scmp.ge.s32.totalorder %s4405_s18, 2 }
  0x6e   : > { %p3595_p9 = por %p4360_p7, %p4359_p5  ;;  %s318_s21 = sand.u32 1, %s3276_s10  }
  0x6f   : > { %s2328_s17 = sshll.u32 %s318_s21, 7  ;;  %s4407_s18 = smov (%p46_p13, %s4405_s18), 0 }
  0x70   : > { %s4361_s29 = scalar_select %p3595_p9, 1, 0 }
  0x71   : > { %s2508_s26 = sshll.u32 %s3288_s13, 4  ;;  %s48_s20 = ssub.s32 %s3292_s14, %s4407_s18 }
  0x72   : > { %4362 = sst [smem:[#allocation35_spill]] %s4361_s29  ;;  %s2331_s25 = sshll.u32 %s3292_s14, 5 }
  0x73   : > { %s50_s4 = sor.u32 %s3448_s19, %s48_s20  ;;  %s329_s3 = sadd.s32 %s2508_s26, %s2331_s25 }
  0x74   : > { %p51_p10 = scmp.eq.s32.totalorder %s50_s4, 0  ;;  %s2332_s30 = sshll.u32 %s329_s3, 7 }
  0x75   : > { %s3610_s12 = scalar_lea.hbm %s4293_s0, %s2332_s30  ;;  %s322_s29 = scalar_lea.vmem [#allocation2], %s2328_s17 }
  0x76   : > { %s332_s24 = sshll.u32 %s322_s29, 4  ;;  %s4363_s28 = sadd.s32 1, %s3276_s10  ;;  %s3617_s24 = int_to_ptr.vmem [resolvable:$true] %s332_s24 }
  0x77   : > { %s3615_s1 = scalar_select %p51_p10, %s3276_s10, %s4363_s28  }
  0x78   : > { %p4364_p0 = scmp.lt.s32.totalorder %s3296_s15, 4  ;;  %s3627_s5 = scalar_lea.sflag [#allocation3], %s318_s21 }
  0x79   : > { %s3130_s26 = scalar_lea.hbm %s3610_s12, 2048  ;;  %s3135_s7 = scalar_lea.hbm %s4293_s0, 8192 }
  0x7a   : > { %p3623_p3 = pnand %p4364_p0, %p3586_p2  ;;  %p3131_p11 = scmp.ne.s32.totalorder %s3610_s12, %s3130_s26 }
  0x7b   : > { %p3136_p6 = scmp.lt.u32.totalorder %s3610_s12, %s4293_s0  ;;  %p3137_p4 = scmp.lt.u32.totalorder %s3135_s7, %s3130_s26 }
  0x7c   : > { %p3132_p12 = pneg %p3623_p3  ;;  %p3139_p5 = scmp.lt.u32.totalorder %s3130_s26, %s3610_s12 }
  0x7d   : > { %p3138_p2 = por %p3137_p4, %p3136_p6 }
  0x7e   : > { %p3133_p8 = pnand %p3132_p12, %p3131_p11 }
  0x7f   : > { %p3140_p7 = por %p3139_p5, %p3138_p2 }
  0x80   : > { %p3134_p1 = pneg %p3133_p8 }
  0x82   : > { %p3141_p13 = pnand %p3140_p7, %p3134_p1 }
  0x84   : > { %3144 = shalt.err (!%p3141_p13)
}
  0x85   : > { %s3145_s21 = scalar_lea.vmem %s3617_s24, 2048  ;;  %s3304_s25 = smov [#allocation2]  }
  0x86   : > { %p3146_p10 = scmp.ne.s32.totalorder %s3617_s24, %s3145_s21  ;;  %s3150_s4 = sshll.u32 %s3304_s25, 4  ;;  %s3151_s4 = int_to_ptr.vmem [resolvable:$false] %s3150_s4 }
  0x87   : > { %s3152_s3 = scalar_lea.vmem %s3151_s4, 4096  ;;  %p3153_p8 = scmp.lt.s32.totalorder %s3617_s24, %s3151_s4 }
  0x88   : > { %p3148_p0 = pnand %p3146_p10, %p3132_p12  ;;  %p3154_p6 = scmp.lt.s32.totalorder %s3152_s3, %s3145_s21 }
  0x8a   : > { %p3149_p11 = pneg %p3148_p0  ;;  %p3155_p4 = por %p3154_p6, %p3153_p8 }
  0x8c   : > { %p3156_p2 = pnand %p3155_p4, %p3149_p11 }
  0x8e   : > { %3159 = shalt.err (!%p3156_p2)
}
  0x8f   : > { %s3305_s30 = smov 256   ;;  %s3306_s11 = smov 16  }
  0x90   : > { %2774 = dma.hbm_to_vmem [thread:$0]  (!%p3623_p3), %s3610_s12, 2048, %s3617_s24, %s3627_s5, %s3305_s30, %s3305_s30, %s3306_s11  }
  0x91   : > { %s3160_s26 = scalar_lea.hbm %s3511_s22, 1024  ;;  %p4366_p1 = scmp.ne.s32.totalorder %s4344_s16, 0 }
  0x92   : > { %p3161_p12 = scmp.ne.s32.totalorder %s3511_s22, %s3160_s26  ;;  %s3165_s7 = scalar_lea.hbm %s4295_s2, 2048 }
  0x93   : > { %p4367_p5 = pneg %p4366_p1  ;;  %p3166_p10 = scmp.lt.u32.totalorder %s3511_s22, %s4295_s2 }
  0x94   : > { %p3167_p0 = scmp.lt.u32.totalorder %s3165_s7, %s3160_s26  ;;  %p3169_p8 = scmp.lt.u32.totalorder %s3160_s26, %s3511_s22 }
  0x95   : > { %p3163_p7 = pnand %p3161_p12, %p4367_p5 }
  0x96   : > { %p3168_p11 = por %p3167_p0, %p3166_p10 }
  0x97   : > { %p3164_p13 = pneg %p3163_p7 }
  0x98   : > { %p3170_p6 = por %p3169_p8, %p3168_p11 }
  0x9a   : > { %p3171_p4 = pnand %p3170_p6, %p3164_p13 }
  0x9c   : > { %3174 = shalt.err (!%p3171_p4)
}
  0x9d   : > { %s3175_s12 = scalar_lea.vmem %s3514_s6, 1024  ;;  %p4368_p2 = pmov %p4367_p5 }
  0x9e   : > { %p3176_p3 = scmp.ne.s32.totalorder %s3514_s6, %s3175_s12  ;;  %s3307_s24 = smov [#allocation7]  }
  0x9f   : > { %s3180_s19 = sshll.u32 %s3307_s24, 4  ;;  %s3181_s19 = int_to_ptr.vmem [resolvable:$false] %s3180_s19 }
  0xa0   : > { %p3178_p12 = pnand %p3176_p3, %p4368_p2  ;;  %s3182_s5 = scalar_lea.vmem %s3181_s19, 2048 }
  0xa1   : > { %p3183_p7 = scmp.lt.s32.totalorder %s3514_s6, %s3181_s19  ;;  %p3184_p10 = scmp.lt.s32.totalorder %s3182_s5, %s3175_s12 }
  0xa2   : > { %p3179_p5 = pneg %p3178_p12 }
  0xa3   : > { %p3185_p0 = por %p3184_p10, %p3183_p7 }
  0xa5   : > { %p3186_p11 = pnand %p3185_p0, %p3179_p5 }
  0xa7   : > { %3189 = shalt.err (!%p3186_p11)
}
  0xa8   : > { %s4369_s21 = smov 8   ;;  %s4370_s25 = smov 128  }
  0xa9   : > { %2780 = dma.hbm_to_vmem [thread:$0]  (!%p4366_p1), %s3511_s22, 1024, %s3514_s6, %s3475_s23, %s4370_s25, %s4370_s25, %s4369_s21  }
  0xaa   : > { %p4371_p13 = scmp.ne.s32.totalorder %s4352_s27, 0 }
  0xab   : > { %s3685_s4 = sand.u32 (!%p4371_p13), 1, %s3272_s9   ;;  %p4372_p8 = scmp.ne.s32.totalorder (!%p4371_p13), %s4347_s8, 0 }
  0xac   : > { %386 = sbr.rel (%p4371_p13) target bundleno = 949 (0x3b5), region = 44  ;;  %s2340_s3 = sshll.u32 (!%p4371_p13), %s3685_s4, 7 }
  0xad   : > { %s389_s30 = scalar_lea.sflag (!%p4371_p13), [#allocation3], %s3685_s4  ;;  %s3689_s11 = scalar_lea.vmem (!%p4371_p13), [#allocation2], %s2340_s3 }
  0xb3   : > { %3235 = dma.done.wait (%p4372_p8), %s389_s30, 2048  }
  0xb4   : > { %3237 = vsyncadd (%p4372_p8), %s389_s30, 4294965248  ;;  %s4373_s16 = sld [smem:[#allocation32_spill]]  ;;  %s4374_s23 = sld [smem:[#allocation25_spill]] }
  0xb5   : > { %s4375_s22 = sld [smem:[#allocation33_spill]] }
  0xba   : > { %s397_s6 = sand.u32 1, %s4373_s16   ;;  %s399_s27 = sand.u32 1, %s4374_s23  }
  0xbb   : > { %s2341_s26 = sshll.u32 %s399_s27, 6  ;;  %s398_s28 = scalar_lea.sflag [#allocation6], %s397_s6 }
  0xbc   : > { %s3699_s29 = scalar_lea.vmem [#allocation5], %s2341_s26  ;;  %p4376_p1 = scmp.ne.s32.totalorder %s4375_s22, 0 }
  0xbe   : > { %3239 = dma.done.wait (%p4376_p1), %s398_s28, 2048  }
  0xbf   : > { %3241 = vsyncadd (%p4376_p1), %s398_s28, 4294965248  ;;  %s3705_s7 = scalar_lea.vmem [#allocation7], %s2341_s26  ;;  %p4377_p6 = scmp.eq.s32.totalorder %s4373_s16, 0 }
  0xc1   : > { %3243 = dma.done.wait (%p4377_p6), [#allocation9], 12288   ;;  %p4378_p4 = pmov %p4377_p6 }
  0xc2   : > { %v3712_v0 = vld [vmem:[%s3689_s11] sm:$0xff]  ;;  %v3715_v1 = vld [vmem:[%s3689_s11 + $0x8] sm:$0xff]  ;;  %v3726_v5 = vld [vmem:[%s3689_s11 + $0x10] sm:$0xff]  ;;  %s4379_s8 = sld [smem:[#allocation29_spill]]  ;;  %s4380_s19 = sld [smem:[#allocation37_spill]] }
  0xc3   : > { %3245 = vsyncadd (%p4378_p4), [#allocation9], 4294955008  ;;  %v3718_v2 = vld [vmem:[%s3689_s11 + $0x20] sm:$0xff]  ;;  %v503_v3 = vadd.f32 %v3715_v1, %v3712_v0  ;;  %v3723_v4 = vld [vmem:[%s3689_s11 + $0x28] sm:$0xff]  ;;  %s4381_s3 = sld [smem:[#allocation38_spill]]  ;;  %s3308_s30 = smov 64  }
  0xc4   : > { %v3729_v6 = vld [vmem:[%s3689_s11 + $0x18] sm:$0xff]  ;;  %v509_v7 = vadd.f32 %v3723_v4, %v3718_v2  ;;  %v3734_v8 = vld [vmem:[%s3689_s11 + $0x30] sm:$0xff]  ;;  %v3744_v12 = vld [vmem:[%s3689_s11 + $0x40] sm:$0xff]  ;;  %s1950_s26 = scalar_lea.sflag [#allocation4], %s3685_s4  ;;  %s4189_s28 = scalar_lea.sflag [#allocation12], %s397_s6 }
  0xc5   : > { %v3737_v9 = vld [vmem:[%s3689_s11 + $0x38] sm:$0xff]  ;;  %504 = vadd.xlane.f32.xlu0 %v503_v3  ;;  %v506_v10 = vadd.f32 %v3729_v6, %v3726_v5  ;;  %v3747_v13 = vld [vmem:[%s3689_s11 + $0x48] sm:$0xff]  ;;  %v3750_v14 = vld [vmem:[%s3689_s11 + $0x50] sm:$0xff] }
  0xc6   : > { %510 = vadd.xlane.f32.xlu1 %v509_v7  ;;  %v512_v11 = vadd.f32 %v3737_v9, %v3734_v8  ;;  %v3753_v15 = vld [vmem:[%s3689_s11 + $0x58] sm:$0xff]  ;;  %v3756_v16 = vld [vmem:[%s3689_s11 + $0x60] sm:$0xff]  ;;  %v3759_v17 = vld [vmem:[%s3689_s11 + $0x68] sm:$0xff]  ;;  %v515_v18 = vadd.f32 %v3747_v13, %v3744_v12 }
  0xc7   : > { %v3764_v19 = vld [vmem:[%s3689_s11 + $0x70] sm:$0xff]  ;;  %v3767_v20 = vld [vmem:[%s3689_s11 + $0x78] sm:$0xff]  ;;  %v518_v21 = vadd.f32 %v3753_v15, %v3750_v14  ;;  %v521_v22 = vadd.f32 %v3759_v17, %v3756_v16  ;;  %v2914_v25 = vld [vmem:[#allocation8 + $0xc] ss:$24 sps:$4 sm:$0xff]   ;;  %s4101_s11 = sshll.u32 %s3685_s4, 6 }
  0xc8   : > { %v524_v23 = vadd.f32 %v3767_v20, %v3764_v19  ;;  %v2912_v24 = vld [vmem:[#allocation8 + $0x4] ss:$24 sps:$4 sm:$0xff]   ;;  %v2916_v26 = vld [vmem:[#allocation8] ss:$24 sps:$4 sm:$0xff]   ;;  %v2918_v28 = vld [vmem:[#allocation8 + $0x34] ss:$24 sps:$4 sm:$0xff]   ;;  %1371 = vmatprep.subr.bf16.mxu1 %v2914_v25 }
  0xc9   : > { %507 = vadd.xlane.f32.xlu0 %v506_v10  ;;  %v2917_v27 = vld [vmem:[#allocation8 + $0x8] ss:$24 sps:$4 sm:$0xff]   ;;  %v2920_v29 = vld [vmem:[#allocation8 + $0x3c] ss:$24 sps:$4 sm:$0xff]   ;;  %1298 = vmatprep.subr.bf16.mxu0 %v2912_v24  ;;  %v2923_v31 = vld [vmem:[#allocation8 + $0x38] ss:$24 sps:$4 sm:$0xff]  }
  0xca   : > { %513 = vadd.xlane.f32.xlu1 %v512_v11  ;;  %1299 = vmatpush1.bf16.msra.mxu0 %v2916_v26  ;;  %v2922_v30 = vld [vmem:[#allocation8 + $0x30] ss:$24 sps:$4 sm:$0xff]   ;;  %v2924_v32 = vld [vmem:[#allocation8 + $0x64] ss:$24 sps:$4 sm:$0xff]   ;;  %v2928_v34 = vld [vmem:[#allocation8 + $0x60] ss:$24 sps:$4 sm:$0xff]  }
  0xcb   : > { %1372 = vmatpush1.bf16.msra.mxu1 %v2917_v27  ;;  %1300 = vmatprep.subr.bf16.mxu0 %v2918_v28  ;;  %v2926_v33 = vld [vmem:[#allocation8 + $0x6c] ss:$24 sps:$4 sm:$0xff]   ;;  %v2929_v35 = vld [vmem:[#allocation8 + $0x68] ss:$24 sps:$4 sm:$0xff]   ;;  %v2932_v37 = vld [vmem:[#allocation8 + $0x9c] ss:$24 sps:$4 sm:$0xff]  }
  0xcc   : > { %1373 = vmatprep.subr.bf16.mxu1 %v2920_v29  ;;  %v2930_v36 = vld [vmem:[#allocation8 + $0x94] ss:$24 sps:$4 sm:$0xff]   ;;  %v2934_v38 = vld [vmem:[#allocation8 + $0x90] ss:$24 sps:$4 sm:$0xff]   ;;  %v2936_v40 = vld [vmem:[#allocation8 + $0xc4] ss:$24 sps:$4 sm:$0xff]  }
  0xcd   : > { %516 = vadd.xlane.f32.xlu0 %v515_v18  ;;  %v2935_v39 = vld [vmem:[#allocation8 + $0x98] ss:$24 sps:$4 sm:$0xff]   ;;  %v2938_v41 = vld [vmem:[#allocation8 + $0xcc] ss:$24 sps:$4 sm:$0xff]   ;;  %v2941_v43 = vld [vmem:[#allocation8 + $0xc8] ss:$24 sps:$4 sm:$0xff]  }
  0xce   : > { %519 = vadd.xlane.f32.xlu1 %v518_v21  ;;  %1301 = vmatpush1.bf16.msra.mxu0 %v2922_v30  ;;  %v2940_v42 = vld [vmem:[#allocation8 + $0xc0] ss:$24 sps:$4 sm:$0xff]   ;;  %v2942_v44 = vld [vmem:[#allocation8 + $0xf4] ss:$24 sps:$4 sm:$0xff]   ;;  %v2946_v46 = vld [vmem:[#allocation8 + $0xf0] ss:$24 sps:$4 sm:$0xff]  }
  0xcf   : > { %1374 = vmatpush1.bf16.msra.mxu1 %v2923_v31  ;;  %1302 = vmatprep.subr.bf16.mxu0 %v2924_v32  ;;  %v2944_v45 = vld [vmem:[#allocation8 + $0xfc] ss:$24 sps:$4 sm:$0xff]   ;;  %v2947_v47 = vld [vmem:[#allocation8 + $0xf8] ss:$24 sps:$4 sm:$0xff]   ;;  %v2950_v49 = vld [vmem:[#allocation8 + $0x12c] ss:$24 sps:$4 sm:$0xff]  }
  0xd0   : > { %1375 = vmatprep.subr.bf16.mxu1 %v2926_v33  ;;  %v2948_v48 = vld [vmem:[#allocation8 + $0x124] ss:$24 sps:$4 sm:$0xff]   ;;  %v2952_v50 = vld [vmem:[#allocation8 + $0x120] ss:$24 sps:$4 sm:$0xff]   ;;  %v2954_v52 = vld [vmem:[#allocation8 + $0x154] ss:$24 sps:$4 sm:$0xff]  }
  0xd1   : > { %522 = vadd.xlane.f32.xlu0 %v521_v22  ;;  %v2953_v51 = vld [vmem:[#allocation8 + $0x128] ss:$24 sps:$4 sm:$0xff]   ;;  %v2956_v53 = vld [vmem:[#allocation8 + $0x15c] ss:$24 sps:$4 sm:$0xff]   ;;  %v2959_v55 = vld [vmem:[#allocation8 + $0x158] ss:$24 sps:$4 sm:$0xff]  }
  0xd2   : > { %525 = vadd.xlane.f32.xlu1 %v524_v23  ;;  %1303 = vmatpush1.bf16.msra.mxu0 %v2928_v34  ;;  %v2958_v54 = vld [vmem:[#allocation8 + $0x150] ss:$24 sps:$4 sm:$0xff]   ;;  %v2960_v56 = vld [vmem:[#allocation8 + $0x184] ss:$24 sps:$4 sm:$0xff]   ;;  %v2964_v58 = vld [vmem:[#allocation8 + $0x180] ss:$24 sps:$4 sm:$0xff]  }
  0xd3   : > { %1376 = vmatpush1.bf16.msra.mxu1 %v2929_v35  ;;  %1304 = vmatprep.subr.bf16.mxu0 %v2930_v36  ;;  %v2962_v57 = vld [vmem:[#allocation8 + $0x18c] ss:$24 sps:$4 sm:$0xff]   ;;  %v2965_v59 = vld [vmem:[#allocation8 + $0x188] ss:$24 sps:$4 sm:$0xff]   ;;  %p475_p3 = scmp.lt.s32.totalorder %s4379_s8, 1  ;;  %s4106_s23 = scalar_lea.vmem [#allocation13], %s4101_s11 }
  0xd4   : > { %1377 = vmatprep.subr.bf16.mxu1 %v2932_v37  ;;  %s4127_s22 = scalar_lea.vmem [#allocation10], %s4101_s11  ;;  %s4131_s27 = scalar_lea.vmem [#allocation11], %s4101_s11 }
  0xd5   : > { %s476_s17 = scalar_select %p475_p3, %s4379_s8, 1 }
  0xd6   : > { %1305 = vmatpush1.bf16.msra.mxu0 %v2934_v38 }
  0xd7   : > { %1378 = vmatpush1.bf16.msra.mxu1 %v2935_v39  ;;  %1306 = vmatprep.subr.bf16.mxu0 %v2936_v40  ;;  %s2511_s20 = sshll.u32 %s476_s17, 4 }
  0xd8   : > { %1379 = vmatprep.subr.bf16.mxu1 %v2938_v41  ;;  %s479_s5 = scalar_lea.vmem %s4380_s19, %s2511_s20 }
  0xda   : > { %1307 = vmatpush1.bf16.msra.mxu0 %v2940_v42 }
  0xdb   : > { %1380 = vmatpush1.bf16.msra.mxu1 %v2941_v43  ;;  %1308 = vmatprep.subr.bf16.mxu0 %v2942_v44 }
  0xdc   : > { %1381 = vmatprep.subr.bf16.mxu1 %v2944_v45 }
  0xde   : > { %1309 = vmatpush1.bf16.msra.mxu0 %v2946_v46 }
  0xdf   : > { %1382 = vmatpush1.bf16.msra.mxu1 %v2947_v47  ;;  %1310 = vmatprep.subr.bf16.mxu0 %v2948_v48 }
  0xe0   : > { %1383 = vmatprep.subr.bf16.mxu1 %v2950_v49 }
  0xe2   : > { %1311 = vmatpush1.bf16.msra.mxu0 %v2952_v50 }
  0xe3   : > { %1384 = vmatpush1.bf16.msra.mxu1 %v2953_v51  ;;  %1312 = vmatprep.subr.bf16.mxu0 %v2954_v52  ;;  %v2966_v52 = vld [vmem:[#allocation8 + $0x1b4] ss:$24 sps:$4 sm:$0xff]  }
  0xe4   : > { %1385 = vmatprep.subr.bf16.mxu1 %v2956_v53  ;;  %v2968_v53 = vld [vmem:[#allocation8 + $0x1bc] ss:$24 sps:$4 sm:$0xff]  }
  0xe6   : > { %1313 = vmatpush1.bf16.msra.mxu0 %v2958_v54  ;;  %v2970_v54 = vld [vmem:[#allocation8 + $0x1b0] ss:$24 sps:$4 sm:$0xff]  }
  0xe7   : > { %1386 = vmatpush1.bf16.msra.mxu1 %v2959_v55  ;;  %1314 = vmatprep.subr.bf16.mxu0 %v2960_v56  ;;  %v2971_v55 = vld [vmem:[#allocation8 + $0x1b8] ss:$24 sps:$4 sm:$0xff]   ;;  %v2972_v56 = vld [vmem:[#allocation8 + $0x1e4] ss:$24 sps:$4 sm:$0xff]  }
  0xe8   : > { %1387 = vmatprep.subr.bf16.mxu1 %v2962_v57  ;;  %v2974_v57 = vld [vmem:[#allocation8 + $0x1ec] ss:$24 sps:$4 sm:$0xff]  }
  0xea   : > { %1315 = vmatpush1.bf16.msra.mxu0 %v2964_v58  ;;  %v2976_v58 = vld [vmem:[#allocation8 + $0x1e0] ss:$24 sps:$4 sm:$0xff]  }
  0xeb   : > { %1388 = vmatpush1.bf16.msra.mxu1 %v2965_v59  ;;  %1316 = vmatprep.subr.bf16.mxu0 %v2966_v52  ;;  %v2977_v59 = vld [vmem:[#allocation8 + $0x1e8] ss:$24 sps:$4 sm:$0xff]  }
  0xec   : > { %1389 = vmatprep.subr.bf16.mxu1 %v2968_v53  ;;  %v502_v53 = vld [vmem:[%s4381_s3] sm:$0x3] }
  0xee   : > { %1317 = vmatpush1.bf16.msra.mxu0 %v2970_v54 }
  0xef   : > { %1390 = vmatpush1.bf16.msra.mxu1 %v2971_v55  ;;  %1318 = vmatprep.subr.bf16.mxu0 %v2972_v56 }
  0xf0   : > { %1391 = vmatprep.subr.bf16.mxu1 %v2974_v57 }
  0xf2   : > { %1319 = vmatpush1.bf16.msra.mxu0 %v2976_v58 }
  0xf3   : > { %1392 = vmatpush1.bf16.msra.mxu1 %v2977_v59 }
 0x152   : > { %v505_v60 = vpop.xlane.xlu0 %504 }
 0x153   : > { %v528_v61 = vmul.f32 0.00390625, %v505_v60  ;;  %v511_v62 = vpop.xlane.xlu1 %510  ;;  %v2978_v60 = vld [vmem:[#allocation8 + $0x214] ss:$24 sps:$4 sm:$0xff]  }
 0x154   : > { %v530_v63 = vmul.f32 0.00390625, %v511_v62  ;;  %v2982_v62 = vld [vmem:[#allocation8 + $0x210] ss:$24 sps:$4 sm:$0xff]   ;;  %1320 = vmatprep.subr.bf16.mxu0 %v2978_v60 }
 0x155   : > { %v3776_v3 = vsub.f32 %v3712_v0, %v528_v61  ;;  %v3779_v7 = vsub.f32 %v3715_v1, %v528_v61  ;;  %v2980_v61 = vld [vmem:[#allocation8 + $0x21c] ss:$24 sps:$4 sm:$0xff]   ;;  %1321 = vmatpush1.bf16.msra.mxu0 %v2982_v62 }
 0x156   : > { %v3782_v10 = vsub.f32 %v3718_v2, %v530_v63  ;;  %v3785_v11 = vsub.f32 %v3723_v4, %v530_v63  ;;  %v508_v18 = vpop.xlane.xlu0 %507  ;;  %v2983_v63 = vld [vmem:[#allocation8 + $0x218] ss:$24 sps:$4 sm:$0xff]   ;;  %1393 = vmatprep.subr.bf16.mxu1 %v2980_v61 }
 0x157   : > { %v529_v21 = vmul.f32 0.00390625, %v508_v18  ;;  %v514_v22 = vpop.xlane.xlu1 %513  ;;  %v552_v23 = vmul.f32 %v3776_v3, %v3776_v3  ;;  %v553_v24 = vmul.f32 %v3779_v7, %v3779_v7  ;;  %1394 = vmatpush1.bf16.msra.mxu1 %v2983_v63  ;;  %v2984_v18 = vld [vmem:[#allocation8 + $0x244] ss:$24 sps:$4 sm:$0xff]  }
 0x158   : > { %v531_v0 = vmul.f32 0.00390625, %v514_v22  ;;  %v556_v1 = vmul.f32 %v3782_v10, %v3782_v10  ;;  %v557_v2 = vmul.f32 %v3785_v11, %v3785_v11  ;;  %v2988_v22 = vld [vmem:[#allocation8 + $0x240] ss:$24 sps:$4 sm:$0xff]   ;;  %1322 = vmatprep.subr.bf16.mxu0 %v2984_v18 }
 0x159   : > { %v3796_v25 = vsub.f32 %v3726_v5, %v529_v21  ;;  %v3799_v4 = vsub.f32 %v3729_v6, %v529_v21  ;;  %v568_v26 = vadd.f32 %v553_v24, %v552_v23  ;;  %v2986_v21 = vld [vmem:[#allocation8 + $0x24c] ss:$24 sps:$4 sm:$0xff]   ;;  %v2989_v23 = vld [vmem:[#allocation8 + $0x248] ss:$24 sps:$4 sm:$0xff]   ;;  %1323 = vmatpush1.bf16.msra.mxu0 %v2988_v22 }
 0x15a   : > { %v3802_v27 = vsub.f32 %v3734_v8, %v531_v0  ;;  %v3805_v28 = vsub.f32 %v3737_v9, %v531_v0  ;;  %v517_v29 = vpop.xlane.xlu0 %516  ;;  %v574_v32 = vadd.f32 %v557_v2, %v556_v1  ;;  %1395 = vmatprep.subr.bf16.mxu1 %v2986_v21  ;;  %v2990_v24 = vld [vmem:[#allocation8 + $0x274] ss:$24 sps:$4 sm:$0xff]   ;;  %v2994_v1 = vld [vmem:[#allocation8 + $0x270] ss:$24 sps:$4 sm:$0xff]  }
 0x15b   : > { %v532_v30 = vmul.f32 0.00390625, %v517_v29  ;;  %569 = vadd.xlane.f32.xlu0 %v568_v26  ;;  %v520_v31 = vpop.xlane.xlu1 %519  ;;  %v554_v33 = vmul.f32 %v3796_v25, %v3796_v25  ;;  %v555_v5 = vmul.f32 %v3799_v4, %v3799_v4  ;;  %1396 = vmatpush1.bf16.msra.mxu1 %v2989_v23  ;;  %v2992_v0 = vld [vmem:[#allocation8 + $0x27c] ss:$24 sps:$4 sm:$0xff]   ;;  %v2995_v2 = vld [vmem:[#allocation8 + $0x278] ss:$24 sps:$4 sm:$0xff]  }
 0x15c   : > { %v533_v6 = vmul.f32 0.00390625, %v520_v31  ;;  %v558_v34 = vmul.f32 %v3802_v27, %v3802_v27  ;;  %v559_v8 = vmul.f32 %v3805_v28, %v3805_v28  ;;  %1324 = vmatprep.subr.bf16.mxu0 %v2990_v24  ;;  %1397 = vmatprep.subr.bf16.mxu1 %v2992_v0  ;;  %v2996_v26 = vld [vmem:[#allocation8 + $0x2a4] ss:$24 sps:$4 sm:$0xff]   ;;  %v3001_v31 = vld [vmem:[#allocation8 + $0x2a8] ss:$24 sps:$4 sm:$0xff]  }
 0x15d   : > { %v3816_v9 = vsub.f32 %v3744_v12, %v532_v30  ;;  %v3819_v35 = vsub.f32 %v3747_v13, %v532_v30  ;;  %v571_v36 = vadd.f32 %v555_v5, %v554_v33  ;;  %1325 = vmatpush1.bf16.msra.mxu0 %v2994_v1  ;;  %v2998_v29 = vld [vmem:[#allocation8 + $0x2ac] ss:$24 sps:$4 sm:$0xff]   ;;  %v3000_v30 = vld [vmem:[#allocation8 + $0x2a0] ss:$24 sps:$4 sm:$0xff]   ;;  %v3004_v33 = vld [vmem:[#allocation8 + $0x2dc] ss:$24 sps:$4 sm:$0xff]  }
 0x15e   : > { %v3822_v37 = vsub.f32 %v3750_v14, %v533_v6  ;;  %v3825_v38 = vsub.f32 %v3753_v15, %v533_v6  ;;  %v523_v39 = vpop.xlane.xlu0 %522  ;;  %v577_v42 = vadd.f32 %v559_v8, %v558_v34  ;;  %1326 = vmatprep.subr.bf16.mxu0 %v2996_v26  ;;  %v3006_v5 = vld [vmem:[#allocation8 + $0x2d0] ss:$24 sps:$4 sm:$0xff]   ;;  %v3010_v34 = vld [vmem:[#allocation8 + $0x14] ss:$24 sps:$4 sm:$0xff]  }
 0x15f   : > { %v534_v40 = vmul.f32 0.00390625, %v523_v39  ;;  %575 = vadd.xlane.f32.xlu0 %v574_v32  ;;  %572 = vadd.xlane.f32.xlu1 %v571_v36  ;;  %v526_v41 = vpop.xlane.xlu1 %525  ;;  %v560_v12 = vmul.f32 %v3816_v9, %v3816_v9  ;;  %v561_v13 = vmul.f32 %v3819_v35, %v3819_v35  ;;  %v3002_v32 = vld [vmem:[#allocation8 + $0x2d4] ss:$24 sps:$4 sm:$0xff]   ;;  %v3007_v6 = vld [vmem:[#allocation8 + $0x2d8] ss:$24 sps:$4 sm:$0xff]   ;;  %v633_v39 = vlaneseq }
 0x160   : > { %v535_v43 = vmul.f32 0.00390625, %v526_v41  ;;  %v562_v14 = vmul.f32 %v3822_v37, %v3822_v37  ;;  %v563_v15 = vmul.f32 %v3825_v38, %v3825_v38  ;;  %1398 = vmatpush1.bf16.msra.mxu1 %v2995_v2  ;;  %v483_v21 = vld [vmem:[%s479_s5] ss:$8 sm:$0x3] }
 0x161   : > { %v3836_v44 = vsub.f32 %v3756_v16, %v534_v40  ;;  %v3839_v45 = vsub.f32 %v3759_v17, %v534_v40  ;;  %v580_v46 = vadd.f32 %v561_v13, %v560_v12  ;;  %1399 = vmatprep.subr.bf16.mxu1 %v2998_v29  ;;  %1327 = vmatpush1.bf16.msra.mxu0 %v3000_v30 }
 0x162   : > { %v3842_v47 = vsub.f32 %v3764_v19, %v535_v43  ;;  %v3845_v48 = vsub.f32 %v3767_v20, %v535_v43  ;;  %v583_v49 = vadd.f32 %v563_v15, %v562_v14  ;;  %1328 = vmatprep.subr.bf16.mxu0 %v3002_v32  ;;  %v634_v43 = vshrl.u32 %v633_v39, 7 }
 0x163   : > { %578 = vadd.xlane.f32.xlu1 %v577_v42  ;;  %581 = vadd.xlane.f32.xlu0 %v580_v46  ;;  %v564_v50 = vmul.f32 %v3836_v44, %v3836_v44  ;;  %v565_v16 = vmul.f32 %v3839_v45, %v3839_v45 }
 0x164   : > { %v566_v17 = vmul.f32 %v3842_v47, %v3842_v47  ;;  %v567_v51 = vmul.f32 %v3845_v48, %v3845_v48  ;;  %1400 = vmatpush1.bf16.msra.mxu1 %v3001_v31 }
 0x165   : > { %v586_v19 = vadd.f32 %v565_v16, %v564_v50  ;;  %1401 = vmatprep.subr.bf16.mxu1 %v3004_v33  ;;  %1329 = vmatpush1.bf16.msra.mxu0 %v3006_v5 }
 0x166   : > { %v589_v20 = vadd.f32 %v567_v51, %v566_v17  ;;  %1444 = vmatprep.subr.bf16.mxu0 %v3010_v34  ;;  %v2349_v17 = vld [vmem:[%s479_s5 + $0x1] ss:$8 sm:$0x3]  ;;  %v639_v51 = vsub.s32 1, %v634_v43 }
 0x167   : > { %584 = vadd.xlane.f32.xlu1 %v583_v49  ;;  %587 = vadd.xlane.f32.xlu0 %v586_v19  ;;  %v635_v19 = vsub.s32 0, %v634_v43  ;;  %v659_v56 = vadd.f32 1.0, %v2349_v17 }
 0x168   : > { %1402 = vmatpush1.bf16.msra.mxu1 %v3007_v6  ;;  %v3863_v59 = vrot.slane %v502_v53, %v639_v51  ;;  %v3875_v31 = vrot.slane %v483_v21, %v639_v51 }
 0x169   : > { %2701 = vmatprep.subr.bf16.mxu1 %v3010_v34  ;;  %v3865_v60 = vrot.slane %v502_v53, %v635_v19  ;;  %v3868_v23 = vrot.slane %v659_v56, %v639_v51  ;;  %v3871_v1 = vrot.slane %v659_v56, %v635_v19  ;;  %v3880_v5 = vrot.slane %v483_v21, %v635_v19  ;;  %v3008_v51 = vld [vmem:[#allocation8 + $0x10] ss:$24 sps:$4 sm:$0xff]   ;;  %v3013_v53 = vld [vmem:[#allocation8 + $0x44] ss:$24 sps:$4 sm:$0xff]  }
 0x16b   : > { %590 = vadd.xlane.f32.xlu1 %v589_v20 }
 0x1e8   : > { %v570_v8 = vpop.xlane.xlu0 %569 }
 0x1e9   : > { %v592_v36 = vmul.f32 0.00390625, %v570_v8 }
 0x1eb   : > { %v600_v40 = vadd.f32 1e-05, %v592_v36 }
 0x1ec   : > { %v573_v41 = vpop.xlane.xlu1 %572  ;;  %v576_v42 = vpop.xlane.xlu0 %575 }
 0x1ed   : > { %3056 = vrsqrt.f32 %v600_v40  ;;  %v593_v12 = vmul.f32 0.00390625, %v573_v41  ;;  %v594_v13 = vmul.f32 0.00390625, %v576_v42 }
 0x1ef   : > { %v601_v14 = vadd.f32 1e-05, %v593_v12  ;;  %v602_v15 = vadd.f32 1e-05, %v594_v13 }
 0x1f0   : > { %v579_v46 = vpop.xlane.xlu1 %578  ;;  %v582_v49 = vpop.xlane.xlu0 %581 }
 0x1f1   : > { %3058 = vrsqrt.f32 %v601_v14  ;;  %v595_v50 = vmul.f32 0.00390625, %v579_v46  ;;  %v596_v16 = vmul.f32 0.00390625, %v582_v49 }
 0x1f2   : > { %3060 = vrsqrt.f32 %v602_v15 }
 0x1f3   : > { %v603_v20 = vadd.f32 1e-05, %v595_v50  ;;  %v604_v52 = vadd.f32 1e-05, %v596_v16 }
 0x1f4   : > { %v585_v54 = vpop.xlane.xlu1 %584  ;;  %v588_v55 = vpop.xlane.xlu0 %587 }
 0x1f5   : > { %3062 = vrsqrt.f32 %v603_v20  ;;  %v597_v57 = vmul.f32 0.00390625, %v585_v54  ;;  %v598_v58 = vmul.f32 0.00390625, %v588_v55 }
 0x1f6   : > { %3064 = vrsqrt.f32 %v604_v52 }
 0x1f7   : > { %v3057_v61 = vpop.eup %3056  ;;  %v605_v62 = vadd.f32 1e-05, %v597_v57  ;;  %v606_v63 = vadd.f32 1e-05, %v598_v58 }
 0x1f8   : > { %v591_v18 = vpop.xlane.xlu1 %590  ;;  %v617_v22 = vmul.f32 %v3057_v61, %v3779_v7  ;;  %v616_v24 = vmul.f32 %v3057_v61, %v3776_v3 }
 0x1f9   : > { %3066 = vrsqrt.f32 %v605_v62  ;;  %v599_v0 = vmul.f32 0.00390625, %v591_v18  ;;  %v3011_v18 = vld [vmem:[#allocation8 + $0x40] ss:$24 sps:$4 sm:$0xff]  }
 0x1fa   : > { %v644_v2 = vmul.f32 %v3863_v59, %v617_v22  ;;  %v643_v26 = vmul.f32 %v3865_v60, %v616_v24  ;;  %3068 = vrsqrt.f32 %v606_v63 }
 0x1fb   : > { %v3059_v29 = vpop.eup %3058  ;;  %v607_v30 = vadd.f32 1e-05, %v599_v0 }
 0x1fc   : > { %v3061_v32 = vpop.eup %3060  ;;  %v619_v7 = vmul.f32 %v3059_v29, %v3799_v4  ;;  %v672_v33 = vmul.f32 %v3868_v23, %v644_v2  ;;  %v618_v3 = vmul.f32 %v3059_v29, %v3796_v25  ;;  %v671_v6 = vmul.f32 %v3871_v1, %v643_v26 }
 0x1fd   : > { %3070 = vrsqrt.f32 %v607_v30  ;;  %v621_v34 = vmul.f32 %v3061_v32, %v3785_v11  ;;  %v620_v8 = vmul.f32 %v3061_v32, %v3782_v10  ;;  %v3014_v32 = vld [vmem:[#allocation8 + $0x70] ss:$24 sps:$4 sm:$0xff]  }
 0x1fe   : > { %v646_v36 = vmul.f32 %v3863_v59, %v619_v7  ;;  %v645_v39 = vmul.f32 %v3865_v60, %v618_v3  ;;  %v699_v4 = vadd.f32 %v3875_v31, %v672_v33  ;;  %v698_v10 = vadd.f32 %v3880_v5, %v671_v6 }
 0x1ff   : > { %v3063_v40 = vpop.eup %3062  ;;  %v648_v41 = vmul.f32 %v3863_v59, %v621_v34  ;;  %v647_v14 = vmul.f32 %v3865_v60, %v620_v8  ;;  %v3019_v34 = vld [vmem:[#allocation8 + $0xa4] ss:$24 sps:$4 sm:$0xff]  }
 0x200   : > { %v3065_v42 = vpop.eup %3064  ;;  %v674_v25 = vmul.f32 %v3868_v23, %v646_v36  ;;  %v673_v12 = vmul.f32 %v3871_v1, %v645_v39  ;;  %v623_v13 = vmul.f32 %v3063_v40, %v3805_v28  ;;  %v622_v11 = vmul.f32 %v3063_v40, %v3802_v27 }
 0x201   : > { %v676_v43 = vmul.f32 %v3868_v23, %v648_v41  ;;  %v625_v15 = vmul.f32 %v3065_v42, %v3819_v35  ;;  %v675_v54 = vmul.f32 %v3871_v1, %v647_v14  ;;  %v624_v61 = vmul.f32 %v3065_v42, %v3816_v9  ;;  %v3016_v9 = vld [vmem:[#allocation8 + $0x74] ss:$24 sps:$4 sm:$0xff]  }
 0x202   : > { %v701_v46 = vadd.f32 %v3875_v31, %v674_v25  ;;  %v700_v49 = vadd.f32 %v3880_v5, %v673_v12  ;;  %v650_v50 = vmul.f32 %v3863_v59, %v623_v13  ;;  %v649_v16 = vmul.f32 %v3865_v60, %v622_v11  ;;  %v3020_v13 = vld [vmem:[#allocation8 + $0xd0] ss:$24 sps:$4 sm:$0xff]  }
 0x203   : > { %v3067_v17 = vpop.eup %3066  ;;  %v652_v28 = vmul.f32 %v3863_v59, %v625_v15  ;;  %v703_v57 = vadd.f32 %v3875_v31, %v676_v43  ;;  %v702_v26 = vadd.f32 %v3880_v5, %v675_v54  ;;  %v651_v29 = vmul.f32 %v3865_v60, %v624_v61  ;;  %v3025_v43 = vld [vmem:[#allocation8 + $0x104] ss:$24 sps:$4 sm:$0xff]   ;;  %v3023_v15 = vld [vmem:[#allocation8 + $0x100] ss:$24 sps:$4 sm:$0xff]   ;;  %v3046_v54 = vld [vmem:[#allocation8 + $0x254] ss:$24 sps:$4 sm:$0xff]  }
 0x204   : > { %v3902_v27 = vpack.c.bf16 %v701_v46, %v699_v4  ;;  %v3904_v19 = vpack.c.bf16 %v700_v49, %v698_v10  ;;  %v678_v20 = vmul.f32 %v3868_v23, %v650_v50  ;;  %v677_v35 = vmul.f32 %v3871_v1, %v649_v16  ;;  %v3069_v52 = vpop.eup %3068  ;;  %v3017_v4 = vld [vmem:[#allocation8 + $0xa0] ss:$24 sps:$4 sm:$0xff]   ;;  %v3028_v46 = vld [vmem:[#allocation8 + $0x134] ss:$24 sps:$4 sm:$0xff]   ;;  %v3026_v50 = vld [vmem:[#allocation8 + $0x130] ss:$24 sps:$4 sm:$0xff]  }
 0x205   : > { %v627_v55 = vmul.f32 %v3067_v17, %v3825_v38  ;;  %v626_v56 = vmul.f32 %v3067_v17, %v3822_v37  ;;  %v680_v38 = vmul.f32 %v3868_v23, %v652_v28  ;;  %v629_v22 = vmul.f32 %v3069_v52, %v3839_v45  ;;  %v3031_v16 = vld [vmem:[#allocation8 + $0x164] ss:$24 sps:$4 sm:$0xff]   ;;  %v3029_v17 = vld [vmem:[#allocation8 + $0x160] ss:$24 sps:$4 sm:$0xff]   ;;  %v3034_v28 = vld [vmem:[#allocation8 + $0x194] ss:$24 sps:$4 sm:$0xff]  }
 0x206   : > { %1330 = vmatprep.mubr.bf16.mxu0 %v3902_v27  ;;  %1403 = vmatprep.mubr.bf16.mxu1 %v3902_v27  ;;  %v705_v58 = vadd.f32 %v3875_v31, %v678_v20  ;;  %v704_v21 = vadd.f32 %v3880_v5, %v677_v35  ;;  %v679_v8 = vmul.f32 %v3871_v1, %v651_v29  ;;  %v3035_v20 = vld [vmem:[#allocation8 + $0x1c0] ss:$24 sps:$4 sm:$0xff]   ;;  %v3040_v35 = vld [vmem:[#allocation8 + $0x1f4] ss:$24 sps:$4 sm:$0xff]   ;;  %v3050_v61 = vld [vmem:[#allocation8 + $0x2b0] ss:$24 sps:$4 sm:$0xff]  }
 0x207   : > { %v3071_v62 = vpop.eup %3070  ;;  %1331 = vmatmul.mubr.bf16.vlgmr.msra.gmra.mrb[0].mxu0 %v3904_v19  ;;  %1404 = vmatmul.mubr.bf16.vlgmr.msra.gmra.mrb[0].mxu1 %v3904_v19  ;;  %v654_v63 = vmul.f32 %v3863_v59, %v627_v55  ;;  %v653_v0 = vmul.f32 %v3865_v60, %v626_v56  ;;  %v707_v33 = vadd.f32 %v3875_v31, %v680_v38  ;;  %v3044_v55 = vld [vmem:[#allocation8 + $0x250] ss:$24 sps:$4 sm:$0xff]   ;;  %v3049_v56 = vld [vmem:[#allocation8 + $0x284] ss:$24 sps:$4 sm:$0xff]  }
 0x208   : > { %1445 = vmatpush1.bf16.msra.mxu0 %v3008_v51  ;;  %2717 = vmatpush1.bf16.msra.mxu1 %v3008_v51  ;;  %v3920_v37 = vpack.c.bf16 %v705_v58, %v703_v57  ;;  %v631_v2 = vmul.f32 %v3071_v62, %v3845_v48  ;;  %v3933_v7 = vpack.c.bf16 %v704_v21, %v702_v26  ;;  %v3037_v51 = vld [vmem:[#allocation8 + $0x1c4] ss:$24 sps:$4 sm:$0xff]   ;;  %v3047_v57 = vld [vmem:[#allocation8 + $0x280] ss:$24 sps:$4 sm:$0xff]   ;;  %v3052_v58 = vld [vmem:[#allocation8 + $0x2b4] ss:$24 sps:$4 sm:$0xff]  }
 0x209   : > { %1446 = vmatprep.subr.bf16.mxu0 %v3013_v53  ;;  %2702 = vmatprep.subr.bf16.mxu1 %v3013_v53  ;;  %v682_v24 = vmul.f32 %v3868_v23, %v654_v63  ;;  %v681_v48 = vmul.f32 %v3871_v1, %v653_v0  ;;  %v656_v3 = vmul.f32 %v3863_v59, %v629_v22  ;;  %v3041_v53 = vld [vmem:[#allocation8 + $0x220] ss:$24 sps:$4 sm:$0xff]  }
 0x20a   : > { %1340 = vmatprep.mubr.bf16.mxu0 %v3920_v37  ;;  %1413 = vmatprep.mubr.bf16.mxu1 %v3920_v37  ;;  %v658_v45 = vmul.f32 %v3863_v59, %v631_v2  ;;  %v630_v6 = vmul.f32 %v3071_v62, %v3842_v47  ;;  %v628_v40 = vmul.f32 %v3069_v52, %v3836_v44  ;;  %v3022_v59 = vld [vmem:[#allocation8 + $0xd4] ss:$24 sps:$4 sm:$0xff]   ;;  %v3038_v52 = vld [vmem:[#allocation8 + $0x1f0] ss:$24 sps:$4 sm:$0xff]   ;;  %v3055_v62 = vld [vmem:[#allocation8 + $0x2e4] ss:$24 sps:$4 sm:$0xff]  }
 0x20b   : > { %v709_v30 = vadd.f32 %v3875_v31, %v682_v24  ;;  %v708_v47 = vadd.f32 %v3880_v5, %v681_v48  ;;  %v684_v41 = vmul.f32 %v3868_v23, %v656_v3  ;;  %v706_v25 = vadd.f32 %v3880_v5, %v679_v8  ;;  %v3053_v63 = vld [vmem:[#allocation8 + $0x2e0] ss:$24 sps:$4 sm:$0xff]  }
 0x20c   : > { %1447 = vmatpush1.bf16.msra.mxu0 %v3011_v18  ;;  %2718 = vmatpush1.bf16.msra.mxu1 %v3011_v18  ;;  %v686_v39 = vmul.f32 %v3868_v23, %v658_v45  ;;  %v657_v42 = vmul.f32 %v3865_v60, %v630_v6  ;;  %v655_v44 = vmul.f32 %v3865_v60, %v628_v40 }
 0x20d   : > { %1448 = vmatprep.subr.bf16.mxu0 %v3016_v9  ;;  %2703 = vmatprep.subr.bf16.mxu1 %v3016_v9  ;;  %v719_v36 = vpack.c.bf16 %v709_v30, %v707_v33  ;;  %v3950_v11 = vpack.c.bf16 %v708_v47, %v706_v25  ;;  %v711_v10 = vadd.f32 %v3875_v31, %v684_v41 }
 0x20e   : > { %v713_v12 = vadd.f32 %v3875_v31, %v686_v39  ;;  %v685_v23 = vmul.f32 %v3871_v1, %v657_v42  ;;  %v683_v60 = vmul.f32 %v3871_v1, %v655_v44 }
 0x20f   : > { %1341 = vmatmul.mubr.bf16.gmra.mrb[4].mxu0 %v3933_v7  ;;  %1414 = vmatmul.mubr.bf16.gmra.mrb[4].mxu1 %v3933_v7 }
 0x210   : > { %1449 = vmatpush1.bf16.msra.mxu0 %v3014_v32  ;;  %2719 = vmatpush1.bf16.msra.mxu1 %v3014_v32  ;;  %v3956_v14 = vpack.c.bf16 %v713_v12, %v711_v10  ;;  %v712_v31 = vadd.f32 %v3880_v5, %v685_v23  ;;  %v710_v49 = vadd.f32 %v3880_v5, %v683_v60  ;;  %v3032_v5 = vld [vmem:[#allocation8 + $0x190] ss:$24 sps:$4 sm:$0xff]  }
 0x211   : > { %1350 = vmatprep.mubr.bf16.mxu0 %v719_v36  ;;  %1423 = vmatprep.mubr.bf16.mxu1 %v719_v36 }
 0x212   : > { %1450 = vmatprep.subr.bf16.mxu0 %v3019_v34  ;;  %2704 = vmatprep.subr.bf16.mxu1 %v3019_v34  ;;  %v3963_v1 = vpack.c.bf16 %v712_v31, %v710_v49 }
 0x214   : > { %1451 = vmatpush1.bf16.msra.mxu0 %v3017_v4  ;;  %2720 = vmatpush1.bf16.msra.mxu1 %v3017_v4 }
 0x215   : > { %1452 = vmatprep.subr.bf16.mxu0 %v3022_v59  ;;  %2705 = vmatprep.subr.bf16.mxu1 %v3022_v59 }
 0x217   : > { %1351 = vmatmul.mubr.bf16.gmra.mrb[8].mxu0 %v3950_v11  ;;  %1424 = vmatmul.mubr.bf16.gmra.mrb[8].mxu1 %v3950_v11 }
 0x218   : > { %1453 = vmatpush1.bf16.msra.mxu0 %v3020_v13  ;;  %2721 = vmatpush1.bf16.msra.mxu1 %v3020_v13 }
 0x219   : > { %1360 = vmatprep.mubr.bf16.mxu0 %v3956_v14  ;;  %1433 = vmatprep.mubr.bf16.mxu1 %v3956_v14 }
 0x21a   : > { %1454 = vmatprep.subr.bf16.mxu0 %v3025_v43  ;;  %2706 = vmatprep.subr.bf16.mxu1 %v3025_v43 }
 0x21c   : > { %1455 = vmatpush1.bf16.msra.mxu0 %v3023_v15  ;;  %2722 = vmatpush1.bf16.msra.mxu1 %v3023_v15 }
 0x21d   : > { %1456 = vmatprep.subr.bf16.mxu0 %v3028_v46  ;;  %2707 = vmatprep.subr.bf16.mxu1 %v3028_v46 }
 0x21f   : > { %1361 = vmatmul.mubr.bf16.gmra.mrb[12].mxu0 %v3963_v1  ;;  %1434 = vmatmul.mubr.bf16.gmra.mrb[12].mxu1 %v3963_v1 }
 0x220   : > { %1457 = vmatpush1.bf16.msra.mxu0 %v3026_v50  ;;  %2723 = vmatpush1.bf16.msra.mxu1 %v3026_v50 }
 0x221   : > { %1476 = vmatprep.mubr.bf16.mxu0 %v3902_v27  ;;  %1496 = vmatprep.mubr.bf16.mxu1 %v719_v36  ;;  %v3043_v27 = vld [vmem:[#allocation8 + $0x224] ss:$24 sps:$4 sm:$0xff]  }
 0x222   : > { %1458 = vmatprep.subr.bf16.mxu0 %v3031_v16  ;;  %2708 = vmatprep.subr.bf16.mxu1 %v3031_v16 }
 0x224   : > { %1459 = vmatpush1.bf16.msra.mxu0 %v3029_v17  ;;  %2724 = vmatpush1.bf16.msra.mxu1 %v3029_v17 }
 0x225   : > { %1460 = vmatprep.subr.bf16.mxu0 %v3034_v28  ;;  %2709 = vmatprep.subr.bf16.mxu1 %v3034_v28 }
 0x228   : > { %1461 = vmatpush1.bf16.msra.mxu0 %v3032_v5  ;;  %2725 = vmatpush1.bf16.msra.mxu1 %v3032_v5 }
 0x229   : > { %1462 = vmatprep.subr.bf16.mxu0 %v3037_v51  ;;  %2710 = vmatprep.subr.bf16.mxu1 %v3037_v51 }
 0x22c   : > { %1463 = vmatpush1.bf16.msra.mxu0 %v3035_v20  ;;  %2726 = vmatpush1.bf16.msra.mxu1 %v3035_v20 }
 0x22d   : > { %1464 = vmatprep.subr.bf16.mxu0 %v3040_v35  ;;  %2711 = vmatprep.subr.bf16.mxu1 %v3040_v35 }
 0x230   : > { %1465 = vmatpush1.bf16.msra.mxu0 %v3038_v52  ;;  %2727 = vmatpush1.bf16.msra.mxu1 %v3038_v52 }
 0x231   : > { %1466 = vmatprep.subr.bf16.mxu0 %v3043_v27  ;;  %2712 = vmatprep.subr.bf16.mxu1 %v3043_v27 }
 0x234   : > { %1467 = vmatpush1.bf16.msra.mxu0 %v3041_v53  ;;  %2728 = vmatpush1.bf16.msra.mxu1 %v3041_v53 }
 0x235   : > { %1468 = vmatprep.subr.bf16.mxu0 %v3046_v54  ;;  %2713 = vmatprep.subr.bf16.mxu1 %v3046_v54  ;;  %v1517_v54 = vld [vmem:[%s3699_s29] sm:$0xff] }
 0x238   : > { %1469 = vmatpush1.bf16.msra.mxu0 %v3044_v55  ;;  %2729 = vmatpush1.bf16.msra.mxu1 %v3044_v55  ;;  %v1525_v55 = vld [vmem:[%s3705_s7] sm:$0xff] }
 0x239   : > { %1470 = vmatprep.subr.bf16.mxu0 %v3049_v56  ;;  %2714 = vmatprep.subr.bf16.mxu1 %v3049_v56  ;;  %v1518_v56 = vld [vmem:[%s3699_s29 + $0x8] sm:$0xff] }
 0x23c   : > { %1471 = vmatpush1.bf16.msra.mxu0 %v3047_v57  ;;  %2730 = vmatpush1.bf16.msra.mxu1 %v3047_v57 }
 0x23d   : > { %1472 = vmatprep.subr.bf16.mxu0 %v3052_v58  ;;  %2715 = vmatprep.subr.bf16.mxu1 %v3052_v58  ;;  %v1526_v58 = vld [vmem:[%s3705_s7 + $0x8] sm:$0xff] }
 0x240   : > { %1473 = vmatpush1.bf16.msra.mxu0 %v3050_v61  ;;  %2731 = vmatpush1.bf16.msra.mxu1 %v3050_v61 }
 0x241   : > { %1474 = vmatprep.subr.bf16.mxu0 %v3055_v62  ;;  %2716 = vmatprep.subr.bf16.mxu1 %v3055_v62 }
 0x244   : > { %1475 = vmatpush1.bf16.msra.mxu0 %v3053_v63  ;;  %2732 = vmatpush1.bf16.msra.mxu1 %v3053_v63 }
 0x247   : > { %1477 = vmatmul.mubr.bf16.vlgmr.msra.gmra.mrb[16].mxu0 %v3904_v19  ;;  %1497 = vmatmul.mubr.bf16.vlgmr.msra.gmra.mrb[16].mxu1 %v3950_v11 }
 0x248   : > { %1486 = vmatprep.mubr.bf16.mxu0 %v3920_v37  ;;  %1506 = vmatprep.mubr.bf16.mxu1 %v3956_v14 }
 0x24f   : > { %1487 = vmatmul.mubr.bf16.gmra.mrb[20].mxu0 %v3933_v7  ;;  %1507 = vmatmul.mubr.bf16.gmra.mrb[20].mxu1 %v3963_v1 }
 0x2da   : > { %v3974_v38 = vpop.f32.mrb[0].mxu0  ;;  %v3976_v18 = vpop.f32.mrb[0].mxu1 }
 0x2db   : > { %v3978_v21 = vpop.f32.mrb[1].mxu1  ;;  %1549 = vrot.lane.b32.xlu0 %v3974_v38, %s3308_s30  ;;  %v3982_v19 = vpop.f32.mrb[1].mxu0  ;;  %v1533_v61 = vmul.f32 %v1517_v54, %v3974_v38 }
 0x2dc   : > { %v3984_v22 = vpop.f32.mrb[2].mxu0  ;;  %v3986_v37 = vpop.f32.mrb[2].mxu1  ;;  %v1541_v38 = vmul.f32 %v1517_v54, %v3982_v19 }
 0x2dd   : > { %v3988_v9 = vpop.f32.mrb[3].mxu1  ;;  %1551 = vrot.lane.b32.xlu1 %v3984_v22, %s3308_s30  ;;  %v3992_v24 = vpop.f32.mrb[3].mxu0 }
 0x2df   : > { %1629 = vrot.lane.b32.xlu0 %v3976_v18, %s3308_s30 }
 0x2e1   : > { %1631 = vrot.lane.b32.xlu1 %v3986_v37, %s3308_s30 }
 0x2e2   : > { %v3998_v0 = vpop.f32.mrb[4].mxu0  ;;  %v4000_v2 = vpop.f32.mrb[4].mxu1 }
 0x2e3   : > { %v4002_v26 = vpop.f32.mrb[5].mxu1  ;;  %1565 = vrot.lane.b32.xlu0 %v3982_v19, %s3308_s30  ;;  %v4006_v29 = vpop.f32.mrb[5].mxu0 }
 0x2e4   : > { %v4008_v30 = vpop.f32.mrb[6].mxu0  ;;  %v4010_v45 = vpop.f32.mrb[6].mxu1 }
 0x2e5   : > { %v4012_v32 = vpop.f32.mrb[7].mxu1  ;;  %1567 = vrot.lane.b32.xlu1 %v3992_v24, %s3308_s30  ;;  %v4016_v7 = vpop.f32.mrb[7].mxu0 }
 0x2e7   : > { %1645 = vrot.lane.b32.xlu0 %v3978_v21, %s3308_s30 }
 0x2e9   : > { %1647 = vrot.lane.b32.xlu1 %v3988_v9, %s3308_s30 }
 0x2ea   : > { %v4022_v33 = vpop.f32.mrb[8].mxu0  ;;  %v4024_v48 = vpop.f32.mrb[8].mxu1 }
 0x2eb   : > { %v4026_v3 = vpop.f32.mrb[9].mxu1  ;;  %1633 = vrot.lane.b32.xlu0 %v4000_v2, %s3308_s30  ;;  %v4030_v6 = vpop.f32.mrb[9].mxu0 }
 0x2ec   : > { %v4032_v34 = vpop.f32.mrb[10].mxu0  ;;  %v4034_v8 = vpop.f32.mrb[10].mxu1 }
 0x2ed   : > { %v4036_v36 = vpop.f32.mrb[11].mxu1  ;;  %1553 = vrot.lane.b32.xlu1 %v3998_v0, %s3308_s30  ;;  %v4040_v39 = vpop.f32.mrb[11].mxu0 }
 0x2ef   : > { %1569 = vrot.lane.b32.xlu0 %v4006_v29, %s3308_s30 }
 0x2f1   : > { %1555 = vrot.lane.b32.xlu1 %v4008_v30, %s3308_s30 }
 0x2f2   : > { %v4046_v40 = vpop.f32.mrb[12].mxu0  ;;  %v4048_v4 = vpop.f32.mrb[12].mxu1 }
 0x2f3   : > { %v4050_v59 = vpop.f32.mrb[13].mxu1  ;;  %1649 = vrot.lane.b32.xlu0 %v4002_v26, %s3308_s30  ;;  %v4054_v47 = vpop.f32.mrb[13].mxu0 }
 0x2f4   : > { %v4056_v41 = vpop.f32.mrb[14].mxu0  ;;  %v4058_v42 = vpop.f32.mrb[14].mxu1 }
 0x2f5   : > { %v4060_v25 = vpop.f32.mrb[15].mxu1  ;;  %1635 = vrot.lane.b32.xlu1 %v4010_v45, %s3308_s30  ;;  %v4064_v12 = vpop.f32.mrb[15].mxu0 }
 0x2f7   : > { %1557 = vrot.lane.b32.xlu0 %v4022_v33, %s3308_s30 }
 0x2f9   : > { %1571 = vrot.lane.b32.xlu1 %v4016_v7, %s3308_s30 }
 0x2fb   : > { %1637 = vrot.lane.b32.xlu0 %v4024_v48, %s3308_s30 }
 0x2fd   : > { %1651 = vrot.lane.b32.xlu1 %v4012_v32, %s3308_s30 }
 0x2ff   : > { %1573 = vrot.lane.b32.xlu0 %v4030_v6, %s3308_s30 }
 0x301   : > { %1559 = vrot.lane.b32.xlu1 %v4032_v34, %s3308_s30 }
 0x303   : > { %1653 = vrot.lane.b32.xlu0 %v4026_v3, %s3308_s30 }
 0x305   : > { %1639 = vrot.lane.b32.xlu1 %v4034_v8, %s3308_s30 }
 0x307   : > { %1561 = vrot.lane.b32.xlu0 %v4046_v40, %s3308_s30 }
 0x309   : > { %1575 = vrot.lane.b32.xlu1 %v4040_v39, %s3308_s30 }
 0x30b   : > { %1641 = vrot.lane.b32.xlu0 %v4048_v4, %s3308_s30 }
 0x30d   : > { %1655 = vrot.lane.b32.xlu1 %v4036_v36, %s3308_s30 }
 0x30f   : > { %1577 = vrot.lane.b32.xlu0 %v4054_v47, %s3308_s30 }
 0x311   : > { %1563 = vrot.lane.b32.xlu1 %v4056_v41, %s3308_s30 }
 0x313   : > { %1657 = vrot.lane.b32.xlu0 %v4050_v59, %s3308_s30 }
 0x315   : > { %1643 = vrot.lane.b32.xlu1 %v4058_v42, %s3308_s30 }
 0x319   : > { %1579 = vrot.lane.b32.xlu1 %v4064_v12, %s3308_s30 }
 0x31a   : > { %v1498_v44 = vpop.f32.mrb[16].mxu1  ;;  %v1478_v13 = vpop.f32.mrb[16].mxu0 }
 0x31b   : > { %v1480_v11 = vpop.f32.mrb[17].mxu0  ;;  %v1500_v10 = vpop.f32.mrb[17].mxu1 }
 0x31c   : > { %v1482_v23 = vpop.f32.mrb[18].mxu0  ;;  %v1502_v43 = vpop.f32.mrb[18].mxu1 }
 0x31d   : > { %v2643_v14 = vpack.c.bf16 %v1482_v23, %v1478_v13  ;;  %v2653_v60 = vpack.c.bf16 %v1502_v43, %v1498_v44  ;;  %v1484_v15 = vpop.f32.mrb[19].mxu0  ;;  %v1504_v46 = vpop.f32.mrb[19].mxu1  ;;  %1659 = vrot.lane.b32.xlu1 %v4060_v25, %s3308_s30  ;;  %v1534_v44 = vmul.f32 %v1518_v56, %v3984_v22 }
 0x31e   : > { %v2663_v31 = vpack.c.bf16 %v1484_v15, %v1480_v11  ;;  %v2673_v49 = vpack.c.bf16 %v1504_v46, %v1500_v10  ;;  %v1614_v15 = vmul.f32 %v1518_v56, %v3986_v37 }
 0x31f   : > { %2644 = vst [vmem:[%s4106_s23] sm:$0xff] %v2643_v14   ;;  %2695 = vst [vmem:[%s4106_s23 + $0x10] sm:$0xff] %v2653_v60   ;;  %v1613_v14 = vmul.f32 %v1517_v54, %v3976_v18 }
 0x320   : > { %2697 = vst [vmem:[%s4106_s23 + $0x20] sm:$0xff] %v2663_v31   ;;  %2699 = vst [vmem:[%s4106_s23 + $0x30] sm:$0xff] %v2673_v49  }
 0x322   : > { %v1488_v50 = vpop.f32.mrb[20].mxu0  ;;  %v1508_v1 = vpop.f32.mrb[20].mxu1 }
 0x323   : > { %v1490_v16 = vpop.f32.mrb[21].mxu0  ;;  %v1510_v17 = vpop.f32.mrb[21].mxu1 }
 0x324   : > { %v1492_v28 = vpop.f32.mrb[22].mxu0  ;;  %v1512_v5 = vpop.f32.mrb[22].mxu1 }
 0x325   : > { %v2648_v51 = vpack.c.bf16 %v1492_v28, %v1488_v50  ;;  %v2658_v20 = vpack.c.bf16 %v1512_v5, %v1508_v1  ;;  %v1494_v35 = vpop.f32.mrb[23].mxu0  ;;  %v1514_v52 = vpop.f32.mrb[23].mxu1  ;;  %v1542_v5 = vmul.f32 %v1518_v56, %v3992_v24 }
 0x326   : > { %v2668_v27 = vpack.c.bf16 %v1494_v35, %v1490_v16  ;;  %v2678_v53 = vpack.c.bf16 %v1514_v52, %v1510_v17  ;;  %v1621_v52 = vmul.f32 %v1517_v54, %v3978_v21  ;;  %v1520_v21 = vld [vmem:[%s3699_s29 + $0x18] sm:$0xff] }
 0x327   : > { %2694 = vst [vmem:[%s4106_s23 + $0x8] sm:$0xff] %v2648_v51   ;;  %2696 = vst [vmem:[%s4106_s23 + $0x18] sm:$0xff] %v2658_v20  }
 0x328   : > { %2698 = vst [vmem:[%s4106_s23 + $0x28] sm:$0xff] %v2668_v27   ;;  %2700 = vst [vmem:[%s4106_s23 + $0x38] sm:$0xff] %v2678_v53   ;;  %v1622_v27 = vmul.f32 %v1518_v56, %v3988_v9 }
 0x34d   : > { %v1550_v57 = vpop.permute.xlu0 %1549 }
 0x34e   : > { %v1581_v62 = vmul.f32 %v1550_v57, %v1525_v55 }
 0x34f   : > { %v1552_v63 = vpop.permute.xlu1 %1551 }
 0x350   : > { %v1597_v13 = vadd.f32 %v1581_v62, %v1533_v61  ;;  %v1582_v11 = vmul.f32 %v1552_v63, %v1526_v58 }
 0x351   : > { %v1630_v10 = vpop.permute.xlu0 %1629 }
 0x352   : > { %v1598_v23 = vadd.f32 %v1582_v11, %v1534_v44  ;;  %v1661_v43 = vmul.f32 %v1630_v10, %v1525_v55  ;;  %v1693_v46 = vmul.f32 0.088388346, %v1597_v13  ;;  %v1519_v11 = vld [vmem:[%s3699_s29 + $0x10] sm:$0xff] }
 0x353   : > { %v1632_v60 = vpop.permute.xlu1 %1631  ;;  %v1527_v10 = vld [vmem:[%s3705_s7 + $0x10] sm:$0xff]  ;;  %v1535_v9 = vmul.f32 %v1519_v11, %v3998_v0 }
 0x354   : > { %v1694_v31 = vmul.f32 0.088388346, %v1598_v23  ;;  %v1662_v49 = vmul.f32 %v1632_v60, %v1526_v58  ;;  %v1677_v22 = vadd.f32 %v1661_v43, %v1613_v14  ;;  %v1528_v14 = vld [vmem:[%s3705_s7 + $0x18] sm:$0xff]  ;;  %v1536_v60 = vmul.f32 %v1520_v21, %v4008_v30 }
 0x355   : > { %v1566_v50 = vpop.permute.xlu0 %1565  ;;  %v1543_v30 = vmul.f32 %v1519_v11, %v4006_v29  ;;  %v1623_v29 = vmul.f32 %v1519_v11, %v4002_v26 }
 0x356   : > { %v2563_v1 = vpack.c.bf16 %v1694_v31, %v1693_v46  ;;  %v1678_v16 = vadd.f32 %v1662_v49, %v1614_v15  ;;  %v1589_v17 = vmul.f32 %v1566_v50, %v1525_v55  ;;  %v1616_v50 = vmul.f32 %v1520_v21, %v4010_v45 }
 0x357   : > { %v1568_v28 = vpop.permute.xlu1 %1567 }
 0x358   : > { %2564 = vst [vmem:[%s4127_s22] sm:$0xff] %v2563_v1   ;;  %v2603_v18 = vpack.c.bf16 %v1678_v16, %v1677_v22  ;;  %v1605_v37 = vadd.f32 %v1589_v17, %v1541_v38  ;;  %v1590_v51 = vmul.f32 %v1568_v28, %v1526_v58  ;;  %v1615_v38 = vmul.f32 %v1519_v11, %v4000_v2 }
 0x359   : > { %v1646_v20 = vpop.permute.xlu0 %1645 }
 0x35a   : > { %2604 = vst [vmem:[%s4131_s27] sm:$0xff] %v2603_v18   ;;  %v1606_v19 = vadd.f32 %v1590_v51, %v1542_v5  ;;  %v1669_v35 = vmul.f32 %v1646_v20, %v1525_v55  ;;  %v1701_v53 = vmul.f32 0.088388346, %v1605_v37  ;;  %v1544_v20 = vmul.f32 %v1520_v21, %v4016_v7 }
 0x35b   : > { %v1648_v24 = vpop.permute.xlu1 %1647 }
 0x35c   : > { %v1702_v57 = vmul.f32 0.088388346, %v1606_v19  ;;  %v1670_v61 = vmul.f32 %v1648_v24, %v1526_v58  ;;  %v1685_v44 = vadd.f32 %v1669_v35, %v1621_v52  ;;  %v1529_v35 = vld [vmem:[%s3705_s7 + $0x20] sm:$0xff] }
 0x35d   : > { %v1634_v62 = vpop.permute.xlu0 %1633 }
 0x35e   : > { %v2583_v63 = vpack.c.bf16 %v1702_v57, %v1701_v53  ;;  %v1686_v13 = vadd.f32 %v1670_v61, %v1622_v27  ;;  %v1663_v31 = vmul.f32 %v1634_v62, %v1527_v10  ;;  %v1624_v53 = vmul.f32 %v1520_v21, %v4012_v32  ;;  %v1521_v57 = vld [vmem:[%s3699_s29 + $0x20] sm:$0xff] }
 0x35f   : > { %v1554_v23 = vpop.permute.xlu1 %1553 }
 0x360   : > { %2683 = vst [vmem:[%s4127_s22 + $0x20] sm:$0xff] %v2583_v63   ;;  %v2623_v55 = vpack.c.bf16 %v1686_v13, %v1685_v44  ;;  %v1583_v43 = vmul.f32 %v1554_v23, %v1527_v10  ;;  %v1679_v5 = vadd.f32 %v1663_v31, %v1615_v38  ;;  %v1522_v13 = vld [vmem:[%s3699_s29 + $0x28] sm:$0xff] }
 0x361   : > { %v1570_v54 = vpop.permute.xlu0 %1569  ;;  %v1538_v26 = vmul.f32 %v1522_v13, %v4032_v34 }
 0x362   : > { %2690 = vst [vmem:[%s4131_s27 + $0x20] sm:$0xff] %v2623_v55   ;;  %v1599_v58 = vadd.f32 %v1583_v43, %v1535_v9  ;;  %v1591_v16 = vmul.f32 %v1570_v54, %v1527_v10  ;;  %v1530_v55 = vld [vmem:[%s3705_s7 + $0x28] sm:$0xff]  ;;  %v1537_v43 = vmul.f32 %v1521_v57, %v4022_v33 }
 0x363   : > { %v1556_v56 = vpop.permute.xlu1 %1555 }
 0x364   : > { %v1584_v15 = vmul.f32 %v1556_v56, %v1528_v14  ;;  %v1695_v22 = vmul.f32 0.088388346, %v1599_v58  ;;  %v1607_v2 = vadd.f32 %v1591_v16, %v1543_v30 }
 0x365   : > { %v1650_v46 = vpop.permute.xlu0 %1649 }
 0x366   : > { %v1600_v49 = vadd.f32 %v1584_v15, %v1536_v60  ;;  %v1671_v24 = vmul.f32 %v1650_v46, %v1527_v10  ;;  %v1703_v62 = vmul.f32 0.088388346, %v1607_v2  ;;  %v1617_v15 = vmul.f32 %v1521_v57, %v4024_v48 }
 0x367   : > { %v1636_v1 = vpop.permute.xlu1 %1635  ;;  %v1618_v46 = vmul.f32 %v1522_v13, %v4034_v8 }
 0x368   : > { %v1696_v17 = vmul.f32 0.088388346, %v1600_v49  ;;  %v1664_v0 = vmul.f32 %v1636_v1, %v1528_v14  ;;  %v1687_v10 = vadd.f32 %v1671_v24, %v1623_v29  ;;  %v1545_v1 = vmul.f32 %v1521_v57, %v4030_v6  ;;  %v1532_v29 = vld [vmem:[%s3705_s7 + $0x38] sm:$0xff] }
 0x369   : > { %v1558_v28 = vpop.permute.xlu0 %1557  ;;  %v1626_v6 = vmul.f32 %v1522_v13, %v4036_v36 }
 0x36a   : > { %v2568_v18 = vpack.c.bf16 %v1696_v17, %v1695_v22  ;;  %v1680_v37 = vadd.f32 %v1664_v0, %v1616_v50  ;;  %v1585_v7 = vmul.f32 %v1558_v28, %v1529_v35  ;;  %v1546_v28 = vmul.f32 %v1522_v13, %v4040_v39 }
 0x36b   : > { %v1572_v51 = vpop.permute.xlu1 %1571 }
 0x36c   : > { %2680 = vst [vmem:[%s4127_s22 + $0x8] sm:$0xff] %v2568_v18   ;;  %v2608_v45 = vpack.c.bf16 %v1680_v37, %v1679_v5  ;;  %v1592_v19 = vmul.f32 %v1572_v51, %v1528_v14  ;;  %v1601_v32 = vadd.f32 %v1585_v7, %v1537_v43  ;;  %v1531_v5 = vld [vmem:[%s3705_s7 + $0x30] sm:$0xff]  ;;  %v1625_v51 = vmul.f32 %v1521_v57, %v4026_v3 }
 0x36d   : > { %v1638_v52 = vpop.permute.xlu0 %1637 }
 0x36e   : > { %2687 = vst [vmem:[%s4131_s27 + $0x8] sm:$0xff] %v2608_v45   ;;  %v1608_v27 = vadd.f32 %v1592_v19, %v1544_v20  ;;  %v1665_v58 = vmul.f32 %v1638_v52, %v1529_v35  ;;  %v1697_v31 = vmul.f32 0.088388346, %v1601_v32  ;;  %v1523_v20 = vld [vmem:[%s3699_s29 + $0x30] sm:$0xff] }
 0x36f   : > { %v1652_v61 = vpop.permute.xlu1 %1651 }
 0x370   : > { %v1704_v63 = vmul.f32 0.088388346, %v1608_v27  ;;  %v1672_v44 = vmul.f32 %v1652_v61, %v1528_v14  ;;  %v1681_v22 = vadd.f32 %v1665_v58, %v1617_v15  ;;  %v1524_v27 = vld [vmem:[%s3699_s29 + $0x38] sm:$0xff] }
 0x371   : > { %v1574_v23 = vpop.permute.xlu0 %1573  ;;  %v1540_v3 = vmul.f32 %v1524_v27, %v4056_v41  ;;  %v1620_v43 = vmul.f32 %v1524_v27, %v4058_v42  ;;  %v1547_v41 = vmul.f32 %v1523_v20, %v4054_v47  ;;  %v1548_v58 = vmul.f32 %v1524_v27, %v4064_v12 }
 0x372   : > { %v2588_v54 = vpack.c.bf16 %v1704_v63, %v1703_v62  ;;  %v1688_v9 = vadd.f32 %v1672_v44, %v1624_v53  ;;  %v1593_v49 = vmul.f32 %v1574_v23, %v1529_v35  ;;  %v1539_v53 = vmul.f32 %v1523_v20, %v4046_v40 }
 0x373   : > { %v1560_v56 = vpop.permute.xlu1 %1559  ;;  %v1627_v47 = vmul.f32 %v1523_v20, %v4050_v59 }
 0x374   : > { %2684 = vst [vmem:[%s4127_s22 + $0x28] sm:$0xff] %v2588_v54   ;;  %v2628_v11 = vpack.c.bf16 %v1688_v9, %v1687_v10  ;;  %v1586_v21 = vmul.f32 %v1560_v56, %v1530_v55  ;;  %v1609_v48 = vadd.f32 %v1593_v49, %v1545_v1 }
 0x375   : > { %v1654_v60 = vpop.permute.xlu0 %1653 }
 0x376   : > { %2691 = vst [vmem:[%s4131_s27 + $0x28] sm:$0xff] %v2628_v11   ;;  %v1602_v14 = vadd.f32 %v1586_v21, %v1538_v26  ;;  %v1673_v18 = vmul.f32 %v1654_v60, %v1529_v35  ;;  %v1705_v19 = vmul.f32 0.088388346, %v1609_v48 }
 0x377   : > { %v1640_v33 = vpop.permute.xlu1 %1639 }
 0x378   : > { %v1698_v38 = vmul.f32 0.088388346, %v1602_v14  ;;  %v1666_v34 = vmul.f32 %v1640_v33, %v1530_v55  ;;  %v1689_v35 = vadd.f32 %v1673_v18, %v1625_v51 }
 0x379   : > { %v1562_v50 = vpop.permute.xlu0 %1561 }
 0x37a   : > { %v2573_v16 = vpack.c.bf16 %v1698_v38, %v1697_v31  ;;  %v1682_v17 = vadd.f32 %v1666_v34, %v1618_v46  ;;  %v1587_v39 = vmul.f32 %v1562_v50, %v1531_v5  ;;  %v1628_v31 = vmul.f32 %v1524_v27, %v4060_v25 }
 0x37b   : > { %v1576_v0 = vpop.permute.xlu1 %1575 }
 0x37c   : > { %2681 = vst [vmem:[%s4127_s22 + $0x10] sm:$0xff] %v2573_v16   ;;  %v2613_v8 = vpack.c.bf16 %v1682_v17, %v1681_v22  ;;  %v1594_v30 = vmul.f32 %v1576_v0, %v1530_v55  ;;  %v1603_v36 = vadd.f32 %v1587_v39, %v1539_v53 }
 0x37d   : > { %v1642_v2 = vpop.permute.xlu0 %1641 }
 0x37e   : > { %2688 = vst [vmem:[%s4131_s27 + $0x10] sm:$0xff] %v2613_v8   ;;  %v1610_v37 = vadd.f32 %v1594_v30, %v1546_v28  ;;  %v1667_v13 = vmul.f32 %v1642_v2, %v1531_v5  ;;  %v1699_v10 = vmul.f32 0.088388346, %v1603_v36 }
 0x37f   : > { %v1656_v45 = vpop.permute.xlu1 %1655 }
 0x380   : > { %v1706_v52 = vmul.f32 0.088388346, %v1610_v37  ;;  %v1674_v24 = vmul.f32 %v1656_v45, %v1530_v55  ;;  %v1619_v55 = vmul.f32 %v1523_v20, %v4048_v4 }
 0x381   : > { %v1578_v44 = vpop.permute.xlu0 %1577 }
 0x382   : > { %v2593_v61 = vpack.c.bf16 %v1706_v52, %v1705_v19  ;;  %v1690_v62 = vadd.f32 %v1674_v24, %v1626_v6  ;;  %v1595_v54 = vmul.f32 %v1578_v44, %v1531_v5  ;;  %v1683_v26 = vadd.f32 %v1667_v13, %v1619_v55 }
 0x383   : > { %v1564_v7 = vpop.permute.xlu1 %1563 }
 0x384   : > { %2685 = vst [vmem:[%s4127_s22 + $0x30] sm:$0xff] %v2593_v61   ;;  %v2633_v57 = vpack.c.bf16 %v1690_v62, %v1689_v35  ;;  %v1588_v63 = vmul.f32 %v1564_v7, %v1532_v29  ;;  %v1611_v14 = vadd.f32 %v1595_v54, %v1547_v41 }
 0x385   : > { %v1658_v21 = vpop.permute.xlu0 %1657 }
 0x386   : > { %2692 = vst [vmem:[%s4131_s27 + $0x30] sm:$0xff] %v2633_v57   ;;  %v1604_v23 = vadd.f32 %v1588_v63, %v1540_v3  ;;  %v1675_v15 = vmul.f32 %v1658_v21, %v1531_v5  ;;  %v1707_v49 = vmul.f32 0.088388346, %v1611_v14 }
 0x387   : > { %v1644_v40 = vpop.permute.xlu1 %1643 }
 0x388   : > { %v1700_v9 = vmul.f32 0.088388346, %v1604_v23  ;;  %v1668_v56 = vmul.f32 %v1644_v40, %v1532_v29  ;;  %v1691_v12 = vadd.f32 %v1675_v15, %v1627_v47 }
 0x38a   : > { %v2578_v32 = vpack.c.bf16 %v1700_v9, %v1699_v10  ;;  %v1684_v11 = vadd.f32 %v1668_v56, %v1620_v43 }
 0x38b   : > { %v1580_v60 = vpop.permute.xlu1 %1579 }
 0x38c   : > { %2682 = vst [vmem:[%s4127_s22 + $0x18] sm:$0xff] %v2578_v32   ;;  %v2618_v4 = vpack.c.bf16 %v1684_v11, %v1683_v26  ;;  %v1596_v42 = vmul.f32 %v1580_v60, %v1532_v29 }
 0x38e   : > { %2689 = vst [vmem:[%s4131_s27 + $0x18] sm:$0xff] %v2618_v4   ;;  %v1612_v46 = vadd.f32 %v1596_v42, %v1548_v58 }
 0x38f   : > { %v1660_v33 = vpop.permute.xlu1 %1659 }
 0x390   : > { %v1708_v38 = vmul.f32 0.088388346, %v1612_v46  ;;  %v1676_v34 = vmul.f32 %v1660_v33, %v1532_v29 }
 0x392   : > { %v2598_v50 = vpack.c.bf16 %v1708_v38, %v1707_v49  ;;  %v1692_v1 = vadd.f32 %v1676_v34, %v1628_v31 }
 0x394   : > { %2686 = vst [vmem:[%s4127_s22 + $0x38] sm:$0xff] %v2598_v50   ;;  %v2638_v22 = vpack.c.bf16 %v1692_v1, %v1691_v12 }
 0x396   : > { %2693 = vst [vmem:[%s4131_s27 + $0x38] sm:$0xff] %v2638_v22  }
 0x397   : > { %s4382_s29 = sld [smem:[#allocation28_spill]]  ;;  %s2498_s20 = sshll.u32 %s4379_s8, 5 }
 0x398   : > { %s1991_s24 = sshll.u32 %s4127_s22, 4  ;;  %s4384_s6 = sld [smem:[#allocation40_spill]]  ;;  %s1992_s24 = int_to_ptr.vmem [resolvable:$true] %s1991_s24 }
 0x399   : > { %s3309_s21 = smov 512   ;;  %s3310_s25 = smov 1024  }
 0x39a   : > { %2743 = sst [smem:[#allocation15]] (%p3595_p9), %s3309_s21  ;;  %s3311_s3 = smov 8  }
 0x39b   : > { %2744 = sst [smem:[#allocation15 + $0x1]] (%p3595_p9), %s3310_s25  ;;  %s3312_s8 = smov 64  }
 0x39c   : > { %2745 = sst [smem:[#allocation15 + $0x2]] (%p3595_p9), %s3311_s3  ;;  %s3313_s30 = smov 4  }
 0x39d   : > { %s2497_s17 = sshll.u32 %s4382_s29, 3  ;;  %2746 = sst [smem:[#allocation15 + $0x3]] (%p3595_p9), %s3312_s8 }
 0x39e   : > { %s1972_s12 = sadd.s32 %s2498_s20, %s2497_s17  ;;  %2747 = sst [smem:[#allocation15 + $0x4]] (%p3595_p9), %s3312_s8 }
 0x39f   : > { %s4194_s19 = sshll.u32 %s1972_s12, 6  ;;  %2748 = sst [smem:[#allocation15 + $0x5]] (%p3595_p9), %s3313_s30 }
 0x3a0   : > { %s1974_s5 = scalar_lea.hbm %s4384_s6, %s4194_s19  ;;  %s3314_s11 = smov [#allocation14]  }
 0x3a1   : > { %s3315_s22 = smov 0  }
 0x3a2   : > { %2749 = dma.general (%p3595_p9), %s1992_s24, 1024, %s1974_s5, %s1950_s26, %s3314_s11, [#allocation15], %s3315_s22, 0  }
 0x3a3   : > { %s4385_s20 = sld [smem:[#allocation41_spill]]  ;;  %s2038_s4 = sshll.u32 %s4131_s27, 4  ;;  %s2039_s4 = int_to_ptr.vmem [resolvable:$true] %s2038_s4 }
 0x3a4   : > { %s3316_s16 = smov 512   ;;  %s3317_s26 = smov 1024  }
 0x3a5   : > { %2750 = sst [smem:[#allocation17]] (%p3595_p9), %s3316_s16  ;;  %s3318_s24 = smov 8  }
 0x3a6   : > { %2751 = sst [smem:[#allocation17 + $0x1]] (%p3595_p9), %s3317_s26  ;;  %s3319_s6 = smov 64  }
 0x3a7   : > { %2752 = sst [smem:[#allocation17 + $0x2]] (%p3595_p9), %s3318_s24  ;;  %s3320_s5 = smov 4  }
 0x3a8   : > { %2753 = sst [smem:[#allocation17 + $0x3]] (%p3595_p9), %s3319_s6  ;;  %s3321_s21 = smov [#allocation16]  }
 0x3a9   : > { %s2021_s12 = scalar_lea.hbm %s4385_s20, %s4194_s19  ;;  %2754 = sst [smem:[#allocation17 + $0x4]] (%p3595_p9), %s3319_s6 }
 0x3aa   : > { %2755 = sst [smem:[#allocation17 + $0x5]] (%p3595_p9), %s3320_s5  ;;  %s3322_s27 = smov 0  }
 0x3ab   : > { %2756 = dma.general (%p3595_p9), %s2039_s4, 1024, %s2021_s12, %s4189_s28, %s3321_s21, [#allocation17], %s3322_s27, 0  }
 0x3ac   : > { %s4386_s8 = sld [smem:[#allocation42_spill]]  ;;  %s2085_s11 = sshll.u32 %s4106_s23, 4  ;;  %s2086_s11 = int_to_ptr.vmem [resolvable:$true] %s2085_s11 }
 0x3ad   : > { %s3323_s22 = smov 512   ;;  %s3324_s29 = smov 1024  }
 0x3ae   : > { %2757 = sst [smem:[#allocation19]] (%p3595_p9), %s3323_s22  ;;  %s3325_s17 = smov 8  }
 0x3af   : > { %2758 = sst [smem:[#allocation19 + $0x1]] (%p3595_p9), %s3324_s29  ;;  %s3326_s20 = smov 64  }
 0x3b0   : > { %2759 = sst [smem:[#allocation19 + $0x2]] (%p3595_p9), %s3325_s17  ;;  %s3327_s12 = smov 4  }
 0x3b1   : > { %2760 = sst [smem:[#allocation19 + $0x3]] (%p3595_p9), %s3326_s20  ;;  %s3329_s23 = smov 0  }
 0x3b2   : > { %s2068_s30 = scalar_lea.hbm %s4386_s8, %s4194_s19  ;;  %2761 = sst [smem:[#allocation19 + $0x4]] (%p3595_p9), %s3326_s20 }
 0x3b3   : > { %2762 = sst [smem:[#allocation19 + $0x5]] (%p3595_p9), %s3327_s12  ;;  %s3328_s19 = smov [#allocation18]  }
 0x3b4   : > { %2763 = dma.general (%p3595_p9), %s2086_s11, 1024, %s2068_s30, %s4189_s28, %s3328_s19, [#allocation19], %s3329_s23, 0  }
 0x3b5 PF: > { %s4387_s4 = sld [smem:[#allocation27_spill]]  ;;  %s4388_s16 = sld [smem:[#allocation34_spill]] }
 0x3b6   : > { %p2794_p2 = scmp.ge.s32.totalorder %s3296_s15, 2 }
 0x3bb   : > { %s2113_s26 = sand.u32 1, %s4387_s4   ;;  %p4389_p12 = scmp.ne.s32.totalorder %s4388_s16, 0 }
 0x3bc   : > { %s2114_s24 = scalar_lea.sflag [#allocation4], %s2113_s26 }
 0x3bd   : > { %p2782_p5 = pnand %p2794_p2, %p4389_p12 }
 0x3bf   : > { %3247 = dma.done.wait (!%p2782_p5), %s2114_s24, 1024  }
 0x3c0   : > { %3249 = vsyncadd (!%p2782_p5), %s2114_s24, 4294966272  ;;  %s4390_s6 = sadd.s32 4294967294, %s3296_s15  }
 0x3c1   : > { %s2122_s5 = sand.u32 1, %s4390_s6  }
 0x3c2   : > { %s2123_s21 = scalar_lea.sflag [#allocation12], %s2122_s5 }
 0x3c3   : > { %3251 = dma.done.wait (!%p2782_p5), %s2123_s21, 2048  }
 0x3c4   : > { %3253 = vsyncadd (!%p2782_p5), %s2123_s21, 4294965248  ;;  %s32_s15 = sadd.s32 1, %s3296_s15   ;;  %s4391_s27 = sld [smem:[#allocation25_spill]] }
 0x3c5   : > { %p29_p9 = scmp.ge.s32.totalorder %s32_s15, 6   ;;  %s4392_s28 = sld [smem:[#allocation26_spill]] }
 0x3c6   : > { %s4393_s29 = sld [smem:[#allocation31_spill]]  ;;  %s4394_s7 = sld [smem:[#allocation30_spill]] }
 0x3c7   : > { %s4395_s30 = smov %s3272_s9  ;;  %s4396_s9 = smov %s3276_s10 }
 0x3c8   : > { %s4397_s10 = smov %s3615_s1  ;;  %s4398_s11 = smov %s3288_s13 }
 0x3c9   : > { %s4399_s12 = smov %s3292_s14  ;;  %s4401_s14 = smov %s4407_s18 }
 0x3ca   :  { %31 = sbr.rel (!%p29_p9) target bundleno = 22 (0x16), region = 168 }
 0x3cc   : > { %s4400_s13 = smov %s4394_s7 }
 0x3d1   :  { %2137 = vsyncpa [#allocation3], 1 }
 0x3d2   :  { %2139 = vsyncpa [#allocation3 + $0x1], 1 }
 0x3d3   :  { %2140 = vsyncpa [#allocation6], 1 }
 0x3d4   :  { %2142 = vsyncpa [#allocation6 + $0x1], 1 }
 0x3d5   :  { %2143 = vsyncpa [#allocation9], 1 }
 0x3d6   :  { %2144 = vsyncpa [#allocation4], 1 }
 0x3d7   :  { %2146 = vsyncpa [#allocation4 + $0x1], 1 }
 0x3d8   :  { %2147 = vsyncpa [#allocation12], 1 }
 0x3d9   :  { %2149 = vsyncpa [#allocation12 + $0x1], 1 }

</bundles_post_ra>
